<compile_context>
chip_gen: v5e
topology: v5e:2x2
jax: 0.10.0
libtpu: 0.0.40
codegen_flags: <defaults>
</compile_context>

<pallas_src>
import jax
import jax.numpy as jnp
import numpy as np
from jax import lax
from jax.experimental import pallas as pl
from jax.experimental.pallas import tpu as pltpu

EPS = 1e-5


# ------------------------------ the Pallas kernel ----------------------------

def _make_kernel(n, h, w, cin_pad, cout):
    hw = h * w
    nhw = n * hw
    cnt1 = n * (h - 2) * (w - 2)          # BN1 valid count (after 1st valid 3x3)
    cnt2 = n * (h - 4) * (w - 4)          # BN2 valid count (after 2nd valid 3x3)
    offs = [kh * w + kw for kh in range(3) for kw in range(3)]  # flat tap offsets

    def rolled_stack(v):
        # v: (C, nhw).  Tap t of a VALID 3x3 conv reads position q + offs[t];
        # in this lane-flattened layout that is a pure lane rotation of the
        # INPUT (XLU, free slot).  Positions whose reads wrap across the
        # bottom/right borders become garbage and are excluded from BN stats
        # (mask columns) and from the final crop.
        parts = [v]                                           # tap (0,0): no roll
        for t in range(1, 9):
            parts.append(pltpu.roll(v, nhw - offs[t], axis=1))
        return jnp.concatenate(parts, axis=0)                 # (9*C, nhw)

    def bn_apply(y, s, s2, inv_cnt, gamma, beta):
        mean = s * inv_cnt
        var = s2 * inv_cnt - mean * mean                      # biased variance
        return (y - mean) * lax.rsqrt(var + EPS) * gamma + beta

    def kernel(x_ref, wf_ref, w2_ref, p_ref, m_ref, o_ref):
        x = x_ref[...]                                        # (cin_pad, nhw) f32

        # ---- conv1 + 1x1 shortcut: ONE bf16 MXU matmul (shared RHS x) -------
        xs = rolled_stack(x).astype(jnp.bfloat16)             # (9*cin_pad, nhw)
        z = jnp.dot(wf_ref[...], xs, preferred_element_type=jnp.float32)
        y = z[0:cout, :]                                      # conv1 output
        sc = z[cout:2 * cout, :]                              # shortcut output
        # NOTE: conv biases omitted — exactly cancelled by training-mode BN.

        # ---- BN1: stats over the valid (h-2)x(w-2) region via MXU ----------
        # mask-column matmul folds masking + cross-lane reduction into one dot.
        st1 = jnp.dot(jnp.concatenate([y, y * y], axis=0), m_ref[:, 0:1],
                      preferred_element_type=jnp.float32)      # (2*cout, 1)
        y = bn_apply(y, st1[0:cout, :], st1[cout:, :], 1.0 / cnt1,
                     p_ref[:, 0:1], p_ref[:, 1:2])
        y = jnp.maximum(y, 0.0)

        # ---- conv2: shift-then-matmul, bf16 operands, K = 9*cout ------------
        ys = rolled_stack(y).astype(jnp.bfloat16)              # (9*cout, nhw)
        y2 = jnp.dot(w2_ref[...], ys, preferred_element_type=jnp.float32)

        # ---- BN2 + shortcut-BN: stats share ONE mask-column matmul ----------
        # columns: [valid (h-4)x(w-4) mask, all-ones (full-map shortcut stats)]
        st = jnp.dot(jnp.concatenate([y2, y2 * y2, sc, sc * sc], axis=0),
                     m_ref[:, 1:3], preferred_element_type=jnp.float32)
        y2 = bn_apply(y2, st[0:cout, 0:1], st[cout:2 * cout, 0:1], 1.0 / cnt2,
                      p_ref[:, 2:3], p_ref[:, 3:4])
        sc = bn_apply(sc, st[2 * cout:3 * cout, 1:2], st[3 * cout:, 1:2],
                      1.0 / nhw, p_ref[:, 4:5], p_ref[:, 5:6])

        # ---- residual + ReLU (crop to the valid window is wrapper-side) -----
        o_ref[...] = jnp.maximum(y2 + sc, 0.0).astype(o_ref.dtype)

    return kernel


# ------------------------------ wrapper (glue) --------------------------------

def basic_block_forward(x_nchw, p, stride=1):
    assert stride == 1, "kernel implements the stride=1 configuration"
    n, cin, h, w = x_nchw.shape
    cout = p["w1"].shape[0]
    nhw = n * h * w
    cin_pad = ((cin + 7) // 8) * 8               # f32 sublane-tile-aligned Cin

    # channels -> sublanes, flattened (n, h, w) -> lanes; zero-pad Cin to 8
    x2 = jnp.transpose(x_nchw, (1, 0, 2, 3)).reshape(cin, nhw)
    x2 = jnp.pad(x2, ((0, cin_pad - cin), (0, 0)))

    def stack_taps_k(w_oihw, ci_pad):
        # (Cout, Cin, 3, 3) -> (Cout, 9*ci_pad); columns ordered (tap, cin) to
        # match rolled_stack's tap-major / channel-minor row order.
        ci = w_oihw.shape[1]
        wt = jnp.transpose(w_oihw, (0, 2, 3, 1))             # (cout, kh, kw, cin)
        wt = jnp.pad(wt, ((0, 0), (0, 0), (0, 0), (0, ci_pad - ci)))
        return wt.reshape(w_oihw.shape[0], 9 * ci_pad)

    # fused conv1 + shortcut weights: shortcut rows use the tap-(0,0) columns
    w1k = stack_taps_k(p["w1"], cin_pad)                               # (cout, 9*cin_pad)
    wsk = jnp.pad(p["ws"].reshape(cout, cin),
                  ((0, 0), (0, 9 * cin_pad - cin)))                    # (cout, 9*cin_pad)
    wf = jnp.concatenate([w1k, wsk], axis=0).astype(jnp.bfloat16)      # (2*cout, 9*cin_pad)
    w2k = stack_taps_k(p["w2"], cout).astype(jnp.bfloat16)             # (cout, 9*cout)

    # all per-channel BN params in a single (cout, 6) input -> one DMA
    packed = jnp.stack([p["g1"], p["be1"], p["g2"], p["be2"],
                        p["gs"], p["bes"]], axis=1).astype(jnp.float32)

    # mask COLUMNS (nhw, 3): valid-after-conv1, valid-after-conv2, all-ones
    rows = jnp.arange(h)[:, None]
    cols = jnp.arange(w)[None, :]
    m1 = ((rows < h - 2) & (cols < w - 2)).astype(jnp.float32).reshape(-1)
    m2 = ((rows < h - 4) & (cols < w - 4)).astype(jnp.float32).reshape(-1)
    masks = jnp.stack([jnp.tile(m1, n), jnp.tile(m2, n),
                       jnp.ones((nhw,), jnp.float32)], axis=1)          # (nhw, 3)

    vmem = pl.BlockSpec(memory_space=pltpu.MemorySpace.VMEM)
    out2d = pl.pallas_call(
        _make_kernel(n, h, w, cin_pad, cout),
        out_shape=jax.ShapeDtypeStruct((cout, nhw), jnp.float32),
        in_specs=[vmem] * 5,
        out_specs=vmem,
        # TODO(synk): at real ResNet sizes, tile NHW with a BlockSpec grid
        # (TILE_NHW a multiple of 128, budgeted against v7x's 64 MiB VMEM —
        # half the v5e/v6e tile), split BN into stats/apply passes (lane rolls
        # must not wrap across tile boundaries -> halo handling), mark the NHW
        # axis "parallel" so v7x's two TensorCores split it, and set an
        # explicit vmem_limit_bytes.  At this toy size a single grid-less call
        # is overhead-bound, so the gridded variant is deliberately deferred.
    )(x2, wf, w2k, packed, masks)

    # crop the valid (h-4)x(w-4) window and return NCHW like the PyTorch module
    out = out2d.reshape(cout, n, h, w)[:, :, :h - 4, :w - 4]
    return jnp.transpose(out, (1, 0, 2, 3))


# ---------------------------- pure-JAX reference ------------------------------

def ref_forward(x_nchw, p):
    hi = jax.lax.Precision.HIGHEST

    def conv(x, wgt, b, stride):
        y = jax.lax.conv_general_dilated(
            x, wgt, (stride, stride), "VALID",
            dimension_numbers=("NCHW", "OIHW", "NCHW"), precision=hi)
        return y + b.reshape(1, -1, 1, 1)

    def bn(y, g, b):
        mean = jnp.mean(y, axis=(0, 2, 3), keepdims=True)
        var = jnp.mean(jnp.square(y - mean), axis=(0, 2, 3), keepdims=True)
        return ((y - mean) * jax.lax.rsqrt(var + EPS)
                * g.reshape(1, -1, 1, 1) + b.reshape(1, -1, 1, 1))

    r = conv(x_nchw, p["w1"], p["b1"], 1)
    r = jax.nn.relu(bn(r, p["g1"], p["be1"]))
    r = conv(r, p["w2"], p["b2"], 1)
    r = bn(r, p["g2"], p["be2"])
    sc = bn(conv(x_nchw, p["ws"], p["bs"], 1), p["gs"], p["bes"])
    hh, ww = r.shape[2], r.shape[3]
    return jax.nn.relu(r + sc[:, :, :hh, :ww])


# -------------------------------- params init --------------------------------

def init_params(key, in_feature, plane):
    ks = jax.random.split(key, 12)
    f32 = jnp.float32
    return {
        "w1": 0.1 * jax.random.normal(ks[0], (plane, in_feature, 3, 3), f32),
        "b1": 0.1 * jax.random.normal(ks[1], (plane,), f32),
        "w2": 0.1 * jax.random.normal(ks[2], (plane, plane, 3, 3), f32),
        "b2": 0.1 * jax.random.normal(ks[3], (plane,), f32),
        "g1": 1.0 + 0.1 * jax.random.normal(ks[4], (plane,), f32),
        "be1": 0.1 * jax.random.normal(ks[5], (plane,), f32),
        "g2": 1.0 + 0.1 * jax.random.normal(ks[6], (plane,), f32),
        "be2": 0.1 * jax.random.normal(ks[7], (plane,), f32),
        "ws": 0.1 * jax.random.normal(ks[8], (plane, in_feature, 1, 1), f32),
        "bs": 0.1 * jax.random.normal(ks[9], (plane,), f32),
        "gs": 1.0 + 0.1 * jax.random.normal(ks[10], (plane,), f32),
        "bes": 0.1 * jax.random.normal(ks[11], (plane,), f32),
    }


if __name__ == "__main__":
    key = jax.random.PRNGKey(0)
    kx, kp = jax.random.split(key)

    in_feature, plane, stride = 4, 8, 1          # shortcut exists (4 != 8)
    x = jax.random.normal(kx, (2, in_feature, 16, 16), jnp.float32)   # NCHW
    params = init_params(kp, in_feature, plane)

    out = jax.block_until_ready(basic_block_forward(x, params, stride=stride))
    ref = jax.block_until_ready(ref_forward(x, params))

    assert out.shape == (2, plane, 12, 12), out.shape
    # tolerance sized for bf16 MXU operands (all BN / elementwise math is f32)
    np.testing.assert_allclose(np.asarray(out), np.asarray(ref),
                               rtol=1e-2, atol=2.5e-2)
    print("KERNEL_OK")
</pallas_src>

<mosaic_0001>
module attributes {stable_mosaic.version = 11 : i64} {
  func.func @kernel(%arg0: memref<8x512xf32, #tpu.memory_space<vmem>>, %arg1: memref<16x72xbf16, #tpu.memory_space<vmem>>, %arg2: memref<8x72xbf16, #tpu.memory_space<vmem>>, %arg3: memref<8x6xf32, #tpu.memory_space<vmem>>, %arg4: memref<512x3xf32, #tpu.memory_space<vmem>>, %arg5: memref<8x512xf32, #tpu.memory_space<vmem>>) attributes {dimension_semantics = [], scalar_prefetch = 0 : i64, scratch_operands = 0 : i64, tpu.core_type = #tpu.core_type<tc>} {
    %c0 = arith.constant 0 : index
    %c0_0 = arith.constant 0 : index
    %0 = vector.load %arg0[%c0, %c0_0] : memref<8x512xf32, #tpu.memory_space<vmem>>, vector<8x512xf32>
    %c511_i32 = arith.constant 511 : i32
    %1 = tpu.dynamic_rotate %0 by %c511_i32 dim 1 : vector<8x512xf32>, i32 -> vector<8x512xf32>
    %c510_i32 = arith.constant 510 : i32
    %2 = tpu.dynamic_rotate %0 by %c510_i32 dim 1 : vector<8x512xf32>, i32 -> vector<8x512xf32>
    %c496_i32 = arith.constant 496 : i32
    %3 = tpu.dynamic_rotate %0 by %c496_i32 dim 1 : vector<8x512xf32>, i32 -> vector<8x512xf32>
    %c495_i32 = arith.constant 495 : i32
    %4 = tpu.dynamic_rotate %0 by %c495_i32 dim 1 : vector<8x512xf32>, i32 -> vector<8x512xf32>
    %c494_i32 = arith.constant 494 : i32
    %5 = tpu.dynamic_rotate %0 by %c494_i32 dim 1 : vector<8x512xf32>, i32 -> vector<8x512xf32>
    %c480_i32 = arith.constant 480 : i32
    %6 = tpu.dynamic_rotate %0 by %c480_i32 dim 1 : vector<8x512xf32>, i32 -> vector<8x512xf32>
    %c479_i32 = arith.constant 479 : i32
    %7 = tpu.dynamic_rotate %0 by %c479_i32 dim 1 : vector<8x512xf32>, i32 -> vector<8x512xf32>
    %c478_i32 = arith.constant 478 : i32
    %8 = tpu.dynamic_rotate %0 by %c478_i32 dim 1 : vector<8x512xf32>, i32 -> vector<8x512xf32>
    %9 = tpu.concatenate %0, %1, %2, %3, %4, %5, %6, %7, %8 in 0 : vector<8x512xf32>, vector<8x512xf32>, vector<8x512xf32>, vector<8x512xf32>, vector<8x512xf32>, vector<8x512xf32>, vector<8x512xf32>, vector<8x512xf32>, vector<8x512xf32> -> vector<72x512xf32>
    %10 = arith.truncf %9 : vector<72x512xf32> to vector<72x512xbf16>
    %c0_1 = arith.constant 0 : index
    %c0_2 = arith.constant 0 : index
    %11 = vector.load %arg1[%c0_1, %c0_2] : memref<16x72xbf16, #tpu.memory_space<vmem>>, vector<16x72xbf16>
    %cst = arith.constant dense<0.000000e+00> : vector<16x512xf32>
    %12 = tpu.matmul %11, %10, %cst {dimension_numbers = #tpu.dot_dimension_numbers<[1], [0], [0], [1], [0, 0, 1, 1], [], []>} : vector<16x72xbf16>, vector<72x512xbf16>, vector<16x512xf32> -> vector<16x512xf32>
    %13 = vector.extract_strided_slice %12 {offsets = [0, 0], sizes = [8, 512], strides = [1, 1]} : vector<16x512xf32> to vector<8x512xf32>
    %14 = vector.extract_strided_slice %12 {offsets = [8, 0], sizes = [8, 512], strides = [1, 1]} : vector<16x512xf32> to vector<8x512xf32>
    %15 = arith.mulf %13, %13 : vector<8x512xf32>
    %16 = tpu.concatenate %13, %15 in 0 : vector<8x512xf32>, vector<8x512xf32> -> vector<16x512xf32>
    %c0_3 = arith.constant 0 : index
    %c0_4 = arith.constant 0 : index
    %17 = vector.load %arg4[%c0_3, %c0_4] : memref<512x3xf32, #tpu.memory_space<vmem>>, vector<512x1xf32>
    %cst_5 = arith.constant dense<0.000000e+00> : vector<16x1xf32>
    %18 = tpu.matmul %16, %17, %cst_5 {dimension_numbers = #tpu.dot_dimension_numbers<[1], [0], [0], [1], [0, 0, 1, 1], [], []>} : vector<16x512xf32>, vector<512x1xf32>, vector<16x1xf32> -> vector<16x1xf32>
    %19 = vector.extract_strided_slice %18 {offsets = [0, 0], sizes = [8, 1], strides = [1, 1]} : vector<16x1xf32> to vector<8x1xf32>
    %20 = vector.extract_strided_slice %18 {offsets = [8, 0], sizes = [8, 1], strides = [1, 1]} : vector<16x1xf32> to vector<8x1xf32>
    %c0_6 = arith.constant 0 : index
    %c0_7 = arith.constant 0 : index
    %21 = vector.load %arg3[%c0_6, %c0_7] : memref<8x6xf32, #tpu.memory_space<vmem>>, vector<8x1xf32>
    %c0_8 = arith.constant 0 : index
    %c1 = arith.constant 1 : index
    %22 = vector.load %arg3[%c0_8, %c1] : memref<8x6xf32, #tpu.memory_space<vmem>>, vector<8x1xf32>
    %cst_9 = arith.constant 0.00255102036 : f32
    %23 = vector.broadcast %cst_9 : f32 to vector<8x1xf32>
    %24 = arith.mulf %19, %23 : vector<8x1xf32>
    %cst_10 = arith.constant 0.00255102036 : f32
    %25 = vector.broadcast %cst_10 : f32 to vector<8x1xf32>
    %26 = arith.mulf %20, %25 : vector<8x1xf32>
    %27 = arith.mulf %24, %24 : vector<8x1xf32>
    %28 = arith.subf %26, %27 : vector<8x1xf32>
    %29 = vector.broadcast %24 : vector<8x1xf32> to vector<8x512xf32>
    %30 = arith.subf %13, %29 : vector<8x512xf32>
    %cst_11 = arith.constant 9.99999974E-6 : f32
    %31 = vector.broadcast %cst_11 : f32 to vector<8x1xf32>
    %32 = arith.addf %28, %31 : vector<8x1xf32>
    %33 = math.rsqrt %32 : vector<8x1xf32>
    %34 = vector.broadcast %33 : vector<8x1xf32> to vector<8x512xf32>
    %35 = arith.mulf %30, %34 : vector<8x512xf32>
    %36 = vector.broadcast %21 : vector<8x1xf32> to vector<8x512xf32>
    %37 = arith.mulf %35, %36 : vector<8x512xf32>
    %38 = vector.broadcast %22 : vector<8x1xf32> to vector<8x512xf32>
    %39 = arith.addf %37, %38 : vector<8x512xf32>
    %cst_12 = arith.constant 0.000000e+00 : f32
    %40 = vector.broadcast %cst_12 : f32 to vector<8x512xf32>
    %41 = arith.maximumf %39, %40 : vector<8x512xf32>
    %c511_i32_13 = arith.constant 511 : i32
    %42 = tpu.dynamic_rotate %41 by %c511_i32_13 dim 1 : vector<8x512xf32>, i32 -> vector<8x512xf32>
    %c510_i32_14 = arith.constant 510 : i32
    %43 = tpu.dynamic_rotate %41 by %c510_i32_14 dim 1 : vector<8x512xf32>, i32 -> vector<8x512xf32>
    %c496_i32_15 = arith.constant 496 : i32
    %44 = tpu.dynamic_rotate %41 by %c496_i32_15 dim 1 : vector<8x512xf32>, i32 -> vector<8x512xf32>
    %c495_i32_16 = arith.constant 495 : i32
    %45 = tpu.dynamic_rotate %41 by %c495_i32_16 dim 1 : vector<8x512xf32>, i32 -> vector<8x512xf32>
    %c494_i32_17 = arith.constant 494 : i32
    %46 = tpu.dynamic_rotate %41 by %c494_i32_17 dim 1 : vector<8x512xf32>, i32 -> vector<8x512xf32>
    %c480_i32_18 = arith.constant 480 : i32
    %47 = tpu.dynamic_rotate %41 by %c480_i32_18 dim 1 : vector<8x512xf32>, i32 -> vector<8x512xf32>
    %c479_i32_19 = arith.constant 479 : i32
    %48 = tpu.dynamic_rotate %41 by %c479_i32_19 dim 1 : vector<8x512xf32>, i32 -> vector<8x512xf32>
    %c478_i32_20 = arith.constant 478 : i32
    %49 = tpu.dynamic_rotate %41 by %c478_i32_20 dim 1 : vector<8x512xf32>, i32 -> vector<8x512xf32>
    %50 = tpu.concatenate %41, %42, %43, %44, %45, %46, %47, %48, %49 in 0 : vector<8x512xf32>, vector<8x512xf32>, vector<8x512xf32>, vector<8x512xf32>, vector<8x512xf32>, vector<8x512xf32>, vector<8x512xf32>, vector<8x512xf32>, vector<8x512xf32> -> vector<72x512xf32>
    %51 = arith.truncf %50 : vector<72x512xf32> to vector<72x512xbf16>
    %c0_21 = arith.constant 0 : index
    %c0_22 = arith.constant 0 : index
    %52 = vector.load %arg2[%c0_21, %c0_22] : memref<8x72xbf16, #tpu.memory_space<vmem>>, vector<8x72xbf16>
    %cst_23 = arith.constant dense<0.000000e+00> : vector<8x512xf32>
    %53 = tpu.matmul %52, %51, %cst_23 {dimension_numbers = #tpu.dot_dimension_numbers<[1], [0], [0], [1], [0, 0, 1, 1], [], []>} : vector<8x72xbf16>, vector<72x512xbf16>, vector<8x512xf32> -> vector<8x512xf32>
    %54 = arith.mulf %53, %53 : vector<8x512xf32>
    %55 = arith.mulf %14, %14 : vector<8x512xf32>
    %56 = tpu.concatenate %53, %54, %14, %55 in 0 : vector<8x512xf32>, vector<8x512xf32>, vector<8x512xf32>, vector<8x512xf32> -> vector<32x512xf32>
    %c0_24 = arith.constant 0 : index
    %c1_25 = arith.constant 1 : index
    %57 = vector.load %arg4[%c0_24, %c1_25] : memref<512x3xf32, #tpu.memory_space<vmem>>, vector<512x2xf32>
    %cst_26 = arith.constant dense<0.000000e+00> : vector<32x2xf32>
    %58 = tpu.matmul %56, %57, %cst_26 {dimension_numbers = #tpu.dot_dimension_numbers<[1], [0], [0], [1], [0, 0, 1, 1], [], []>} : vector<32x512xf32>, vector<512x2xf32>, vector<32x2xf32> -> vector<32x2xf32>
    %59 = vector.extract_strided_slice %58 {offsets = [0, 0], sizes = [8, 1], strides = [1, 1]} : vector<32x2xf32> to vector<8x1xf32>
    %60 = vector.extract_strided_slice %58 {offsets = [8, 0], sizes = [8, 1], strides = [1, 1]} : vector<32x2xf32> to vector<8x1xf32>
    %c0_27 = arith.constant 0 : index
    %c2 = arith.constant 2 : index
    %61 = vector.load %arg3[%c0_27, %c2] : memref<8x6xf32, #tpu.memory_space<vmem>>, vector<8x1xf32>
    %c0_28 = arith.constant 0 : index
    %c3 = arith.constant 3 : index
    %62 = vector.load %arg3[%c0_28, %c3] : memref<8x6xf32, #tpu.memory_space<vmem>>, vector<8x1xf32>
    %cst_29 = arith.constant 0.00347222225 : f32
    %63 = vector.broadcast %cst_29 : f32 to vector<8x1xf32>
    %64 = arith.mulf %59, %63 : vector<8x1xf32>
    %cst_30 = arith.constant 0.00347222225 : f32
    %65 = vector.broadcast %cst_30 : f32 to vector<8x1xf32>
    %66 = arith.mulf %60, %65 : vector<8x1xf32>
    %67 = arith.mulf %64, %64 : vector<8x1xf32>
    %68 = arith.subf %66, %67 : vector<8x1xf32>
    %69 = vector.broadcast %64 : vector<8x1xf32> to vector<8x512xf32>
    %70 = arith.subf %53, %69 : vector<8x512xf32>
    %cst_31 = arith.constant 9.99999974E-6 : f32
    %71 = vector.broadcast %cst_31 : f32 to vector<8x1xf32>
    %72 = arith.addf %68, %71 : vector<8x1xf32>
    %73 = math.rsqrt %72 : vector<8x1xf32>
    %74 = vector.broadcast %73 : vector<8x1xf32> to vector<8x512xf32>
    %75 = arith.mulf %70, %74 : vector<8x512xf32>
    %76 = vector.broadcast %61 : vector<8x1xf32> to vector<8x512xf32>
    %77 = arith.mulf %75, %76 : vector<8x512xf32>
    %78 = vector.broadcast %62 : vector<8x1xf32> to vector<8x512xf32>
    %79 = arith.addf %77, %78 : vector<8x512xf32>
    %80 = vector.extract_strided_slice %58 {offsets = [16, 1], sizes = [8, 1], strides = [1, 1]} : vector<32x2xf32> to vector<8x1xf32>
    %81 = vector.extract_strided_slice %58 {offsets = [24, 1], sizes = [8, 1], strides = [1, 1]} : vector<32x2xf32> to vector<8x1xf32>
    %c0_32 = arith.constant 0 : index
    %c4 = arith.constant 4 : index
    %82 = vector.load %arg3[%c0_32, %c4] : memref<8x6xf32, #tpu.memory_space<vmem>>, vector<8x1xf32>
    %c0_33 = arith.constant 0 : index
    %c5 = arith.constant 5 : index
    %83 = vector.load %arg3[%c0_33, %c5] : memref<8x6xf32, #tpu.memory_space<vmem>>, vector<8x1xf32>
    %cst_34 = arith.constant 0.001953125 : f32
    %84 = vector.broadcast %cst_34 : f32 to vector<8x1xf32>
    %85 = arith.mulf %80, %84 : vector<8x1xf32>
    %cst_35 = arith.constant 0.001953125 : f32
    %86 = vector.broadcast %cst_35 : f32 to vector<8x1xf32>
    %87 = arith.mulf %81, %86 : vector<8x1xf32>
    %88 = arith.mulf %85, %85 : vector<8x1xf32>
    %89 = arith.subf %87, %88 : vector<8x1xf32>
    %90 = vector.broadcast %85 : vector<8x1xf32> to vector<8x512xf32>
    %91 = arith.subf %14, %90 : vector<8x512xf32>
    %cst_36 = arith.constant 9.99999974E-6 : f32
    %92 = vector.broadcast %cst_36 : f32 to vector<8x1xf32>
    %93 = arith.addf %89, %92 : vector<8x1xf32>
    %94 = math.rsqrt %93 : vector<8x1xf32>
    %95 = vector.broadcast %94 : vector<8x1xf32> to vector<8x512xf32>
    %96 = arith.mulf %91, %95 : vector<8x512xf32>
    %97 = vector.broadcast %82 : vector<8x1xf32> to vector<8x512xf32>
    %98 = arith.mulf %96, %97 : vector<8x512xf32>
    %99 = vector.broadcast %83 : vector<8x1xf32> to vector<8x512xf32>
    %100 = arith.addf %98, %99 : vector<8x512xf32>
    %101 = arith.addf %79, %100 : vector<8x512xf32>
    %cst_37 = arith.constant 0.000000e+00 : f32
    %102 = vector.broadcast %cst_37 : f32 to vector<8x512xf32>
    %103 = arith.maximumf %101, %102 : vector<8x512xf32>
    %c0_38 = arith.constant 0 : index
    %c0_39 = arith.constant 0 : index
    %104 = vector.load %arg5[%c0_38, %c0_39] : memref<8x512xf32, #tpu.memory_space<vmem>>, vector<8x512xf32>
    tpu.vector_store %arg5[%c0_38, %c0_39], %103 {strides = array<i32>} : memref<8x512xf32, #tpu.memory_space<vmem>>, vector<8x512xf32>,
    return
  }
}

</mosaic_0001>

<bundles_post_ra>
// kernel: tpu_custom_call.1
= control target key start
LH: loop header
LB: loop body
LE: loop exit
PB: predicated region body
PF: predicated region fallthrough
CT: control target
= control target key end

     0   :  { %s2556_s0 = inlined_call_operand.vmem [shape: f32[8,512], index: 0, kind: input, shape index: {}]   ;;  %s2557_s1 = inlined_call_operand.vmem [shape: bf16[16,72], index: 1, kind: input, shape index: {}]   ;;  %s2558_s2 = inlined_call_operand.vmem [shape: bf16[8,72], index: 2, kind: input, shape index: {}]   ;;  %s2559_s3 = inlined_call_operand.vmem [shape: f32[8,6], index: 3, kind: input, shape index: {}]   ;;  %s2560_s4 = inlined_call_operand.vmem [shape: f32[512,3], index: 4, kind: input, shape index: {}]   ;;  %s2561_s5 = inlined_call_operand.hbm [shape: f32[8,512], index: 5, kind: output, shape index: {}]  }
   0x1   :  { %v1553_v0 = vld [vmem:[%s2556_s0 + $0x10] sm:$0xff]  ;;  %v1558_v1 = vld [vmem:[%s2556_s0 + $0x18] sm:$0xff]  ;;  %v1563_v2 = vld [vmem:[%s2556_s0] sm:$0xff] }
   0x2   :  { %v1175_v3 = vpack.i.bf16 %v1558_v1, %v1553_v0  ;;  %v1570_v4 = vld [vmem:[%s2556_s0 + $0x8] sm:$0xff] }
   0x3   :  { %10 = vsyncpa [#allocation3], 0  ;;  %v1185_v5 = vpack.i.bf16 %v1570_v4, %v1563_v2  ;;  %s1505_s26 = smov 96   ;;  %s1506_s27 = smov 94   ;;  %v34_v8 = vlaneseq  ;;  %vm163_vm1 = vcmask 1043456   ;;  %vm159_vm9 = vcmask 588800  }
   0x4   :  { %1176 = vrot.lane.b32.xlu1 %v1175_v3, %s1505_s26  ;;  %1166 = vrot.lane.b32.xlu0 %v1175_v3, %s1506_s27  ;;  %s1507_s28 = smov 95   ;;  %s1508_s0 = smov 110  }
   0x5   :  { %1186 = vrot.lane.b32.xlu2 %v1185_v5, %s1505_s26  ;;  %s1509_s29 = smov 111   ;;  %s1510_s30 = smov 126   ;;  %v1605_v9 = vand.u32 127, %v34_v8 }
   0x6   :  { %s1511_s6 = smov 112   ;;  %s1512_s7 = smov 127  }
   0x7   :  { %2594 = vst [vmem:[#allocation5_spill] sm:$0xff] %v1605_v9  ;;  %vm127_vm0 = vcmp.lt.s32.totalorder %v1605_v9, 94  ;;  %vm101_vm2 = vcmp.lt.s32.totalorder %v1605_v9, 96  ;;  %vm114_vm3 = vcmp.lt.s32.totalorder %v1605_v9, 95  ;;  %vm88_vm4 = vcmp.lt.s32.totalorder %v1605_v9, 110 }
   0x8   :  { %vm75_vm5 = vcmp.lt.s32.totalorder %v1605_v9, 111  ;;  %vm62_vm6 = vcmp.lt.s32.totalorder %v1605_v9, 112  ;;  %vm49_vm7 = vcmp.lt.s32.totalorder %v1605_v9, 126  ;;  %vm36_vm8 = vcmp.lt.s32.totalorder %v1605_v9, 127 }
   0xc   :  { %1181 = vrot.lane.b32.xlu1 %v1175_v3, %s1507_s28  ;;  %1171 = vrot.lane.b32.xlu0 %v1185_v5, %s1506_s27 }
   0xd   :  { %1191 = vrot.lane.b32.xlu2 %v1185_v5, %s1507_s28 }
  0x14   :  { %1201 = vrot.lane.b32.xlu1 %v1175_v3, %s1508_s0  ;;  %1196 = vrot.lane.b32.xlu0 %v1175_v3, %s1509_s29 }
  0x15   :  { %67 = vrot.lane.b32.xlu2 %v1563_v2, %s1509_s29 }
  0x1c   :  { %1206 = vrot.lane.b32.xlu1 %v1175_v3, %s1510_s30  ;;  %80 = vrot.lane.b32.xlu0 %v1563_v2, %s1508_s0 }
  0x1d   :  { %1211 = vrot.lane.b32.xlu2 %v1175_v3, %s1511_s6 }
  0x24   :  { %54 = vrot.lane.b32.xlu1 %v1563_v2, %s1511_s6  ;;  %41 = vrot.lane.b32.xlu0 %v1563_v2, %s1510_s30 }
  0x25   :  { %1216 = vrot.lane.b32.xlu2 %v1175_v3, %s1512_s7 }
  0x2c   :  { %69 = vrot.lane.b32.xlu1 %v1570_v4, %s1509_s29  ;;  %26 = vrot.lane.b32.xlu0 %v1563_v2, %s1512_s7 }
  0x2d   :  { %82 = vrot.lane.b32.xlu2 %v1570_v4, %s1508_s0 }
  0x34   :  { %56 = vrot.lane.b32.xlu1 %v1570_v4, %s1511_s6  ;;  %43 = vrot.lane.b32.xlu0 %v1570_v4, %s1510_s30 }
  0x35   :  { %28 = vrot.lane.b32.xlu2 %v1570_v4, %s1512_s7 }
  0x5f   :  { %v1187_v6 = vpop.permute.xlu2 %1186 }
  0x60   :  { %v1189_v28 = vunpack.i.h.bf16 %v1187_v6  ;;  %v1188_v29 = vunpack.i.l.bf16 %v1187_v6 }
  0x62   :  { %v104_v40 = vsel %vm101_vm2, %v1188_v29, %v1189_v28 }
  0x67   :  { %v1192_v7 = vpop.permute.xlu2 %1191 }
  0x68   :  { %v1194_v20 = vunpack.i.h.bf16 %v1192_v7  ;;  %v1193_v21 = vunpack.i.l.bf16 %v1192_v7 }
  0x6a   :  { %v117_v41 = vsel %vm114_vm3, %v1193_v21, %v1194_v20 }
  0x6b   :  { %v144_v50 = vpack.c.bf16 %v117_v41, %v104_v40  ;;  %v1778_v40 = vld [vmem:[%s2560_s4 + $0x68] sm:$0xff] }
  0x6c   :  { %v1783_v41 = vld [vmem:[%s2560_s4 + $0xe8] sm:$0xff] }
  0x6f   :  { %v1608_v14 = vpop.permute.xlu2 %67 }
  0x76   :  { %v1177_v10 = vpop.permute.xlu1 %1176  ;;  %v1167_v11 = vpop.permute.xlu0 %1166 }
  0x77   :  { %v1169_v12 = vunpack.i.h.bf16 %v1167_v11  ;;  %v1168_v13 = vunpack.i.l.bf16 %v1167_v11  ;;  %v1179_v17 = vunpack.i.h.bf16 %v1177_v10  ;;  %v1178_v18 = vunpack.i.l.bf16 %v1177_v10  ;;  %v1625_v35 = vpop.permute.xlu2 %1211 }
  0x78   :  { %v1214_v60 = vunpack.i.h.bf16 %v1625_v35  ;;  %v1213_v61 = vunpack.i.l.bf16 %v1625_v35 }
  0x79   :  { %v128_v15 = vsel %vm127_vm0, %v1168_v13, %v1169_v12  ;;  %v102_v30 = vsel %vm101_vm2, %v1178_v18, %v1179_v17  ;;  %v103_v46 = vsel %vm101_vm2, %v1189_v28, %v1178_v18  ;;  %v105_v52 = vsel %vm101_vm2, %v1179_v17, %v1188_v29  ;;  %v1698_v18 = vld [vmem:[%s2560_s4 + $0x178] sm:$0xff] }
  0x7a   :  { %v150_v16 = vpack.c.bf16 %v128_v15, %v128_v15  ;;  %v63_v8 = vsel %vm62_vm6, %v1213_v61, %v1214_v60  ;;  %v1738_v29 = vld [vmem:[%s2560_s4 + $0xf8] sm:$0xff] }
  0x7c   :  { %v171_v19 = vsel %vm163_vm1, %v150_v16, 0 }
  0x7d   :  { %207 = vmatpush.bf16.msra.mxu2 %v171_v19  ;;  %v1703_v19 = vld [vmem:[%s2560_s4 + $0x170] sm:$0xff] }
  0x7e   :  { %v1182_v22 = vpop.permute.xlu1 %1181  ;;  %v1172_v23 = vpop.permute.xlu0 %1171 }
  0x7f   :  { %v1184_v24 = vunpack.i.h.bf16 %v1182_v22  ;;  %v1183_v25 = vunpack.i.l.bf16 %v1182_v22  ;;  %v1174_v26 = vunpack.i.h.bf16 %v1172_v23  ;;  %v1173_v27 = vunpack.i.l.bf16 %v1172_v23  ;;  %v1663_v63 = vpop.permute.xlu2 %1216  ;;  %v1710_v22 = vld [vmem:[%s2560_s4 + $0x168] sm:$0xff]  ;;  %v1715_v23 = vld [vmem:[%s2560_s4 + $0x1f8] sm:$0xff] }
  0x80   :  { %v1219_v3 = vunpack.i.h.bf16 %v1663_v63  ;;  %v1218_v5 = vunpack.i.l.bf16 %v1663_v63  ;;  %v2029_v63 = vld [vmem:[%s2560_s4 + $0x1b0] sm:$0xff] }
  0x81   :  { %v115_v31 = vsel %vm114_vm3, %v1183_v25, %v1184_v24  ;;  %v130_v32 = vsel %vm127_vm0, %v1173_v27, %v1174_v26  ;;  %v129_v33 = vsel %vm127_vm0, %v1174_v26, %v1168_v13  ;;  %v131_v34 = vsel %vm127_vm0, %v1169_v12, %v1173_v27  ;;  %v1726_v26 = vld [vmem:[%s2560_s4 + $0x160] sm:$0xff]  ;;  %v1731_v27 = vld [vmem:[%s2560_s4 + $0x1f0] sm:$0xff] }
  0x82   :  { %v146_v36 = vpack.c.bf16 %v115_v31, %v102_v30  ;;  %v148_v37 = vpack.c.bf16 %v130_v32, %v130_v32  ;;  %v149_v38 = vpack.c.bf16 %v129_v33, %v129_v33  ;;  %v151_v39 = vpack.c.bf16 %v131_v34, %v131_v34  ;;  %v1748_v30 = vld [vmem:[%s2560_s4 + $0x158] sm:$0xff]  ;;  %v1755_v32 = vld [vmem:[%s2560_s4 + $0x70] sm:$0xff]  ;;  %v2190_v31 = vld [vmem:[%s2560_s4 + $0x80] sm:$0xff] }
  0x83   :  { %v116_v42 = vsel %vm114_vm3, %v1194_v20, %v1183_v25  ;;  %v118_v47 = vsel %vm114_vm3, %v1184_v24, %v1193_v21  ;;  %v37_v17 = vsel %vm36_vm8, %v1218_v5, %v1219_v3  ;;  %v1720_v24 = vld [vmem:[%s2560_s4 + $0x78] sm:$0xff]  ;;  %v1760_v33 = vld [vmem:[%s2560_s4 + $0xf0] sm:$0xff]  ;;  %2616 = vst [vmem:[#allocation27_spill] sm:$0xff] %v2190_v31 }
  0x84   :  { %208 = vmatpush.bf16.msra.mxu2 %v146_v36  ;;  %v165_v43 = vsel %vm163_vm1, %v148_v37, 0  ;;  %v168_v44 = vsel %vm163_vm1, %v149_v38, 0  ;;  %v174_v45 = vsel %vm163_vm1, %v151_v39, 0  ;;  %v145_v51 = vpack.c.bf16 %v116_v42, %v103_v46  ;;  %v1769_v37 = vld [vmem:[%s2560_s4 + $0x1e8] sm:$0xff]  ;;  %v1929_v46 = vld [vmem:[%s2560_s4 + $0x130] sm:$0xff]  ;;  %v1956_v38 = vld [vmem:[%s2560_s4 + $0xb8] sm:$0xff] }
  0x85   :  { %179 = vmatpush.bf16.msra.mxu0 %v165_v43  ;;  %193 = vmatpush.bf16.msra.mxu1 %v168_v44  ;;  %v147_v57 = vpack.c.bf16 %v118_v47, %v105_v52  ;;  %v134_v25 = vpack.c.bf16 %v37_v17, %v1553_v0  ;;  %v1743_v0 = vld [vmem:[%s2557_s1] sm:$0xff]  ;;  %v1794_v44 = vld [vmem:[%s2560_s4 + $0x150] sm:$0xff]  ;;  %v1813_v52 = vld [vmem:[%s2560_s4 + $0x148] sm:$0xff] }
  0x86   :  { %221 = vmatpush.bf16.msra.mxu3 %v174_v45  ;;  %v1641_v48 = vpop.permute.xlu1 %1201  ;;  %v1643_v49 = vpop.permute.xlu0 %1196  ;;  %v1799_v45 = vld [vmem:[%s2560_s4 + $0x1e0] sm:$0xff]  ;;  %v1869_v17 = vld [vmem:[%s2560_s4 + $0x1c8] sm:$0xff]  ;;  %v2152_v39 = vld [vmem:[%s2560_s4 + $0x10] sm:$0xff] }
  0x87   :  { %v1204_v53 = vunpack.i.h.bf16 %v1641_v48  ;;  %v1203_v54 = vunpack.i.l.bf16 %v1641_v48  ;;  %v1199_v55 = vunpack.i.h.bf16 %v1643_v49  ;;  %v1198_v56 = vunpack.i.l.bf16 %v1643_v49  ;;  %v1934_v49 = vld [vmem:[%s2560_s4 + $0x128] sm:$0xff]  ;;  %2611 = vst [vmem:[#allocation22_spill] sm:$0xff] %v2152_v39  ;;  %v2157_v21 = vld [vmem:[%s2560_s4 + $0x90] sm:$0xff] }
  0x88   :  { %2612 = vst [vmem:[#allocation23_spill] sm:$0xff] %v2157_v21 }
  0x89   :  { %180 = vmatpush.bf16.msra.mxu0 %v144_v50  ;;  %194 = vmatpush.bf16.msra.mxu1 %v145_v51  ;;  %v76_v58 = vsel %vm75_vm5, %v1198_v56, %v1199_v55  ;;  %v89_v59 = vsel %vm88_vm4, %v1203_v54, %v1204_v53  ;;  %v79_v13 = vsel %vm75_vm5, %v1199_v55, %v1608_v14  ;;  %v1808_v50 = vld [vmem:[%s2560_s4 + $0x60] sm:$0xff] }
  0x8a   :  { %222 = vmatpush.bf16.msra.mxu3 %v147_v57  ;;  %v142_v62 = vpack.c.bf16 %v89_v59, %v76_v58  ;;  %v1825_v57 = vld [vmem:[%s2560_s4 + $0xe0] sm:$0xff] }
  0x8b   :  { %v1831_v58 = vld [vmem:[%s2560_s4 + $0x140] sm:$0xff] }
  0x8c   :  { %209 = vmatpush.bf16.msra.mxu2 %v142_v62  ;;  %v1843_v62 = vld [vmem:[%s2560_s4 + $0xd8] sm:$0xff]  ;;  %v1903_v59 = vld [vmem:[%s2560_s4 + $0x40] sm:$0xff] }
  0x8e   :  { %v1667_v6 = vpop.permute.xlu1 %1206  ;;  %v1669_v7 = vpop.permute.xlu0 %80 }
  0x8f   :  { %v1209_v10 = vunpack.i.h.bf16 %v1667_v6  ;;  %v1208_v11 = vunpack.i.l.bf16 %v1667_v6  ;;  %v92_v12 = vsel %vm88_vm4, %v1204_v53, %v1669_v7  ;;  %v1818_v53 = vld [vmem:[%s2560_s4 + $0x1d8] sm:$0xff] }
  0x90   :  { %v143_v15 = vpack.c.bf16 %v92_v12, %v79_v13  ;;  %v1857_v13 = vld [vmem:[%s2560_s4 + $0x50] sm:$0xff] }
  0x91   :  { %v50_v16 = vsel %vm49_vm7, %v1208_v11, %v1209_v10 }
  0x92   :  { %223 = vmatpush.bf16.msra.mxu3 %v143_v15  ;;  %v138_v20 = vpack.c.bf16 %v63_v8, %v50_v16  ;;  %v1848_v8 = vld [vmem:[%s2560_s4 + $0x1d0] sm:$0xff]  ;;  %v83_v16 = vpop.permute.xlu2 %82 }
  0x93   :  { %v1862_v15 = vld [vmem:[%s2560_s4 + $0xd0] sm:$0xff] }
  0x94   :  { %210 = vmatpush.bf16.msra.mxu2 %v138_v20  ;;  %v1891_v20 = vld [vmem:[%s2560_s4 + $0xc8] sm:$0xff] }
  0x96   :  { %v1762_v34 = vpop.permute.xlu1 %54  ;;  %v1764_v36 = vpop.permute.xlu0 %41 }
  0x97   :  { %v66_v42 = vsel %vm62_vm6, %v1214_v60, %v1762_v34  ;;  %v53_v43 = vsel %vm49_vm7, %v1209_v10, %v1764_v36  ;;  %v1838_v60 = vld [vmem:[%s2560_s4 + $0x58] sm:$0xff]  ;;  %v91_v10 = vsel %vm88_vm4, %v1669_v7, %v83_v16 }
  0x98   :  { %v139_v51 = vpack.c.bf16 %v66_v42, %v53_v43  ;;  %211 = vmatpush.bf16.msra.mxu2 %v134_v25  ;;  %v1878_v42 = vld [vmem:[%s2560_s4 + $0x48] sm:$0xff]  ;;  %v1884_v43 = vld [vmem:[%s2560_s4 + $0x138] sm:$0xff]  ;;  %v1896_v25 = vld [vmem:[%s2560_s4 + $0x1c0] sm:$0xff] }
  0x9a   :  { %224 = vmatpush.bf16.msra.mxu3 %v139_v51  ;;  %v90_v51 = vsel %vm88_vm4, %v83_v16, %v1203_v54  ;;  %v1951_v16 = vld [vmem:[%s2560_s4 + $0x38] sm:$0xff] }
  0x9b   :  { %1143 = vmatmul.msk.bf16.vlgmr.msra.gmra.mxu2 %vm159_vm9, %v1743_v0 }
  0x9c   :  { %346 = vmatpush.msrb.mxu2 %v1698_v18 }
  0x9e   :  { %347 = vmatpush.msrb.mxu2 %v1703_v19  ;;  %v70_v12 = vpop.permute.xlu1 %69  ;;  %v27_v47 = vpop.permute.xlu0 %26 }
  0x9f   :  { %v77_v55 = vsel %vm75_vm5, %v70_v12, %v1198_v56  ;;  %v78_v48 = vsel %vm75_vm5, %v1608_v14, %v70_v12  ;;  %v40_v54 = vsel %vm36_vm8, %v1219_v3, %v27_v47  ;;  %v1939_v56 = vld [vmem:[%s2560_s4 + $0x1b8] sm:$0xff]  ;;  %v1946_v3 = vld [vmem:[%s2560_s4 + $0xc0] sm:$0xff] }
  0xa0   :  { %348 = vmatpush.msrb.mxu2 %v1710_v22  ;;  %v140_v14 = vpack.c.bf16 %v91_v10, %v78_v48  ;;  %v141_v7 = vpack.c.bf16 %v90_v51, %v77_v55  ;;  %v135_v12 = vpack.c.bf16 %v40_v54, %v1558_v1  ;;  %v29_v51 = vpop.permute.xlu2 %28  ;;  %v2162_v1 = vld [vmem:[%s2560_s4 + $0x8] sm:$0xff] }
  0xa1   :  { %v39_v6 = vsel %vm36_vm8, %v27_v47, %v29_v51  ;;  %v2065_v47 = vld [vmem:[%s2560_s4 + $0x30] sm:$0xff]  ;;  %2613 = vst [vmem:[#allocation24_spill] sm:$0xff] %v2162_v1 }
  0xa2   :  { %349 = vmatpush.msrb.mxu2 %v1726_v26  ;;  %181 = vmatpush.bf16.msra.mxu0 %v140_v14 }
  0xa3   :  { %195 = vmatpush.bf16.msra.mxu1 %v141_v7  ;;  %225 = vmatpush.bf16.msra.mxu3 %v135_v12 }
  0xa4   :  { %350 = vmatpush.msrb.mxu2 %v1748_v30 }
  0xa6   :  { %351 = vmatpush.msrb.mxu2 %v1794_v44  ;;  %1144 = vmatmul.msk.bf16.vlgmr.msra.gmra.mxu3 %vm159_vm9, %v1743_v0  ;;  %v57_v48 = vpop.permute.xlu1 %56  ;;  %v44_v54 = vpop.permute.xlu0 %43 }
  0xa7   :  { %369 = vmatpush.msrb.mxu3 %v1715_v23  ;;  %v64_v10 = vsel %vm62_vm6, %v57_v48, %v1213_v61  ;;  %v65_v14 = vsel %vm62_vm6, %v1762_v34, %v57_v48  ;;  %v51_v7 = vsel %vm49_vm7, %v44_v54, %v1208_v11  ;;  %v52_v12 = vsel %vm49_vm7, %v1764_v36, %v44_v54  ;;  %v2052_v36 = vld [vmem:[%s2560_s4 + $0x1a0] sm:$0xff]  ;;  %v2087_v48 = vld [vmem:[%s2560_s4 + $0x28] sm:$0xff] }
  0xa8   :  { %v136_v55 = vpack.c.bf16 %v65_v14, %v52_v12  ;;  %v137_v35 = vpack.c.bf16 %v64_v10, %v51_v7  ;;  %352 = vmatpush.msrb.mxu2 %v1813_v52  ;;  %v38_v61 = vsel %vm36_vm8, %v29_v51, %v1218_v5  ;;  %v132_v11 = vpack.c.bf16 %v39_v6, %v1563_v2  ;;  %v2011_v2 = vld [vmem:[%s2560_s4 + $0x120] sm:$0xff]  ;;  %v2034_v5 = vld [vmem:[%s2560_s4 + $0x110] sm:$0xff]  ;;  %v2075_v10 = vld [vmem:[%s2560_s4 + $0x108] sm:$0xff] }
  0xa9   :  { %370 = vmatpush.msrb.mxu3 %v1731_v27  ;;  %v133_v34 = vpack.c.bf16 %v38_v61, %v1570_v4  ;;  %v2020_v4 = vld [vmem:[%s2560_s4 + $0x118] sm:$0xff]  ;;  %2596 = vst [vmem:[#allocation7_spill] sm:$0xff] %v2034_v5  ;;  %v2092_v54 = vld [vmem:[%s2560_s4 + $0xa8] sm:$0xff]  ;;  %v2099_v14 = vld [vmem:[%s2560_s4 + $0x100] sm:$0xff] }
  0xaa   :  { %182 = vmatpush.bf16.msra.mxu0 %v136_v55  ;;  %196 = vmatpush.bf16.msra.mxu1 %v137_v35  ;;  %2595 = vst [vmem:[#allocation6_spill] sm:$0xff] %v2020_v4  ;;  %v2070_v55 = vld [vmem:[%s2560_s4 + $0xb0] sm:$0xff]  ;;  %v2082_v51 = vld [vmem:[%s2560_s4 + $0x198] sm:$0xff]  ;;  %v2109_v12 = vld [vmem:[%s2560_s4 + $0x20] sm:$0xff] }
  0xab   :  { %371 = vmatpush.msrb.mxu3 %v1769_v37  ;;  %353 = vmatpush.msrb.mxu2 %v1831_v58  ;;  %2598 = vst [vmem:[#allocation9_spill] sm:$0xff] %v2052_v36  ;;  %v2104_v7 = vld [vmem:[%s2560_s4 + $0x190] sm:$0xff]  ;;  %v2116_v35 = vld [vmem:[%s2560_s4 + $0xa0] sm:$0xff]  ;;  %v2121_v61 = vld [vmem:[%s2560_s4 + $0x188] sm:$0xff] }
  0xac   :  { %2599 = vst [vmem:[#allocation10_spill] sm:$0xff] %v2075_v10  ;;  %v2131_v6 = vld [vmem:[%s2560_s4 + $0x18] sm:$0xff] }
  0xad   :  { %372 = vmatpush.msrb.mxu3 %v1799_v45  ;;  %354 = vmatpush.msrb.mxu2 %v1884_v43  ;;  %2600 = vst [vmem:[#allocation11_spill] sm:$0xff] %v2082_v51 }
  0xae   :  { %183 = vmatpush.bf16.msra.mxu0 %v132_v11  ;;  %197 = vmatpush.bf16.msra.mxu1 %v133_v34  ;;  %2601 = vst [vmem:[#allocation12_spill] sm:$0xff] %v2087_v48  ;;  %v2136_v11 = vld [vmem:[%s2560_s4 + $0x98] sm:$0xff]  ;;  %v2141_v34 = vld [vmem:[%s2560_s4 + $0x180] sm:$0xff] }
  0xaf   :  { %373 = vmatpush.msrb.mxu3 %v1818_v53  ;;  %355 = vmatpush.msrb.mxu2 %v1929_v46  ;;  %2602 = vst [vmem:[#allocation13_spill] sm:$0xff] %v2092_v54 }
  0xb0   :  { %2603 = vst [vmem:[#allocation14_spill] sm:$0xff] %v2099_v14 }
  0xb1   :  { %374 = vmatpush.msrb.mxu3 %v1848_v8  ;;  %1141 = vmatmul.msk.bf16.vlgmr.msra.gmra.mxu0 %vm159_vm9, %v1743_v0  ;;  %2604 = vst [vmem:[#allocation15_spill] sm:$0xff] %v2104_v7 }
  0xb2   :  { %300 = vmatpush.msrb.mxu0 %v1720_v24  ;;  %323 = vmatpush.msrb.mxu1 %v1738_v29  ;;  %2605 = vst [vmem:[#allocation16_spill] sm:$0xff] %v2109_v12 }
  0xb3   :  { %1142 = vmatmul.msk.bf16.vlgmr.msra.gmra.mxu1 %vm159_vm9, %v1743_v0  ;;  %375 = vmatpush.msrb.mxu3 %v1869_v17  ;;  %v2043_v0 = vld [vmem:[%s2560_s4 + $0x1a8] sm:$0xff]  ;;  %2606 = vst [vmem:[#allocation17_spill] sm:$0xff] %v2116_v35 }
  0xb4   :  { %301 = vmatpush.msrb.mxu0 %v1755_v32  ;;  %324 = vmatpush.msrb.mxu1 %v1760_v33  ;;  %2597 = vst [vmem:[#allocation8_spill] sm:$0xff] %v2043_v0 }
  0xb5   :  { %356 = vmatpush.msrb.mxu2 %v1934_v49  ;;  %376 = vmatpush.msrb.mxu3 %v1896_v25  ;;  %2607 = vst [vmem:[#allocation18_spill] sm:$0xff] %v2121_v61 }
  0xb6   :  { %302 = vmatpush.msrb.mxu0 %v1778_v40  ;;  %325 = vmatpush.msrb.mxu1 %v1783_v41  ;;  %2608 = vst [vmem:[#allocation19_spill] sm:$0xff] %v2131_v6 }
  0xb7   :  { %357 = vmatpush.msrb.mxu2 %v2011_v2  ;;  %377 = vmatpush.msrb.mxu3 %v1939_v56  ;;  %2609 = vst [vmem:[#allocation20_spill] sm:$0xff] %v2136_v11 }
  0xb8   :  { %303 = vmatpush.msrb.mxu0 %v1808_v50  ;;  %326 = vmatpush.msrb.mxu1 %v1825_v57  ;;  %2610 = vst [vmem:[#allocation21_spill] sm:$0xff] %v2141_v34 }
  0xb9   :  { %358 = vmatpush.msrb.mxu2 %v2020_v4  ;;  %378 = vmatpush.msrb.mxu3 %v2029_v63 }
  0xba   :  { %304 = vmatpush.msrb.mxu0 %v1838_v60  ;;  %327 = vmatpush.msrb.mxu1 %v1843_v62 }
  0xbb   :  { %359 = vmatpush.msrb.mxu2 %v2034_v5  ;;  %379 = vmatpush.msrb.mxu3 %v2043_v0 }
  0xbc   :  { %305 = vmatpush.msrb.mxu0 %v1857_v13  ;;  %328 = vmatpush.msrb.mxu1 %v1862_v15 }
  0xbd   :  { %380 = vmatpush.msrb.mxu3 %v2052_v36  ;;  %360 = vmatpush.msrb.mxu2 %v2075_v10  ;;  %v2174_v10 = vld [vmem:[%s2560_s4 + $0x88] sm:$0xff] }
  0xbe   :  { %306 = vmatpush.msrb.mxu0 %v1878_v42  ;;  %329 = vmatpush.msrb.mxu1 %v1891_v20  ;;  %2614 = vst [vmem:[#allocation25_spill] sm:$0xff] %v2174_v10 }
  0xbf   :  { %381 = vmatpush.msrb.mxu3 %v2082_v51  ;;  %361 = vmatpush.msrb.mxu2 %v2099_v14 }
  0xc0   :  { %307 = vmatpush.msrb.mxu0 %v1903_v59  ;;  %330 = vmatpush.msrb.mxu1 %v1946_v3 }
  0xc1   :  { %382 = vmatpush.msrb.mxu3 %v2104_v7 }
  0xc2   :  { %308 = vmatpush.msrb.mxu0 %v1951_v16  ;;  %331 = vmatpush.msrb.mxu1 %v1956_v38 }
  0xc3   :  { %383 = vmatpush.msrb.mxu3 %v2121_v61 }
  0xc4   :  { %309 = vmatpush.msrb.mxu0 %v2065_v47  ;;  %332 = vmatpush.msrb.mxu1 %v2070_v55 }
  0xc5   :  { %384 = vmatpush.msrb.mxu3 %v2141_v34 }
  0xc6   :  { %310 = vmatpush.msrb.mxu0 %v2087_v48  ;;  %333 = vmatpush.msrb.mxu1 %v2092_v54 }
  0xc8   :  { %311 = vmatpush.msrb.mxu0 %v2109_v12  ;;  %334 = vmatpush.msrb.mxu1 %v2116_v35 }
  0xca   :  { %312 = vmatpush.msrb.mxu0 %v2131_v6  ;;  %335 = vmatpush.msrb.mxu1 %v2136_v11  ;;  %v2185_v11 = vld [vmem:[%s2560_s4] sm:$0xff] }
  0xcb   :  { %2615 = vst [vmem:[#allocation26_spill] sm:$0xff] %v2185_v11 }
  0xcc   :  { %313 = vmatpush.msrb.mxu0 %v2152_v39  ;;  %336 = vmatpush.msrb.mxu1 %v2157_v21 }
  0xce   :  { %314 = vmatpush.msrb.mxu0 %v2162_v1  ;;  %337 = vmatpush.msrb.mxu1 %v2174_v10 }
  0xd0   :  { %315 = vmatpush.msrb.mxu0 %v2185_v11  ;;  %338 = vmatpush.msrb.mxu1 %v2190_v31  ;;  %v2584_v31 = vmov 0  }
  0xd1   :  { %1220 = vset.pattern.permute.xlu0 %v2584_v31  ;;  %1222 = vset.pattern.permute.xlu1 %v2584_v31 }
  0xd2   :  { %1221 = vset.pattern.permute.xlu2 %v2584_v31 }
 0x11e   :  { %v2196_v51 = vpop.f32.mrf.mxu2 }
 0x11f   :  { %362 = vmatmul.f32.vlgmr.msrb.gmra.mxu2 %v2196_v51  ;;  %v234_v61 = vmul.f32 %v2196_v51, %v2196_v51 }
 0x126   :  { %v2219_v7 = vpop.f32.mrf.mxu2 }
 0x127   :  { %365 = vmatmul.f32.gmra.mxu2 %v234_v61  ;;  %2617 = vst [vmem:[#allocation28_spill] sm:$0xff] %v2219_v7 }
 0x129   :  { %v2201_v1 = vpop.f32.mrf.mxu3 }
 0x12a   :  { %385 = vmatmul.f32.vlgmr.msrb.gmra.mxu3 %v2201_v1  ;;  %v235_v28 = vmul.f32 %v2201_v1, %v2201_v1 }
 0x12e   :  { %v2204_v10 = vpop.f32.mrf.mxu0 }
 0x12f   :  { %316 = vmatmul.f32.vlgmr.msrb.gmra.mxu0 %v2204_v10  ;;  %v232_v11 = vmul.f32 %v2204_v10, %v2204_v10 }
 0x130   :  { %v2206_v34 = vpop.f32.mrf.mxu1 }
 0x131   :  { %339 = vmatmul.f32.vlgmr.msrb.gmra.mxu1 %v2206_v34  ;;  %v233_v61 = vmul.f32 %v2206_v34, %v2206_v34  ;;  %v2225_v21 = vpop.f32.mrf.mxu3 }
 0x132   :  { %388 = vmatmul.f32.gmra.mxu3 %v235_v28  ;;  %2620 = vst [vmem:[#allocation31_spill] sm:$0xff] %v2225_v21  ;;  %v2230_v21 = vld [vmem:[%s2559_s3] sm:$0xff] }
 0x133   :  { %2621 = vst [vmem:[#allocation32_spill] sm:$0xff] %v2230_v21  ;;  %428 = vperm.xlu2 %1221, %v2230_v21  }
 0x136   :  { %v2221_v39 = vpop.f32.mrf.mxu0 }
 0x137   :  { %319 = vmatmul.f32.gmra.mxu0 %v232_v11  ;;  %2618 = vst [vmem:[#allocation29_spill] sm:$0xff] %v2221_v39 }
 0x138   :  { %v2223_v28 = vpop.f32.mrf.mxu1 }
 0x139   :  { %342 = vmatmul.f32.gmra.mxu1 %v233_v61  ;;  %2619 = vst [vmem:[#allocation30_spill] sm:$0xff] %v2223_v28 }
 0x1a2   :  { %v363_v14 = vpop.f32.mrf.mxu2 }
 0x1aa   :  { %v366_v31 = vpop.f32.mrf.mxu2 }
 0x1ac   :  { %v317_v6 = vpop.f32.mrf.mxu0 }
 0x1ad   :  { %v386_v61 = vpop.f32.mrf.mxu3 }
 0x1ae   :  { %v340_v5 = vpop.f32.mrf.mxu1 }
 0x1af   :  { %v341_v11 = vadd.f32 %v340_v5, %v317_v6 }
 0x1b1   :  { %v364_v35 = vadd.f32 %v363_v14, %v341_v11  ;;  %v2591_v14 = vmov 1  }
 0x1b3   :  { %v387_v12 = vadd.f32 %v386_v61, %v364_v35 }
 0x1b4   :  { %v320_v9 = vpop.f32.mrf.mxu0 }
 0x1b5   :  { %v393_v36 = vmul.f32 0.0025510204, %v387_v12  ;;  %v389_v4 = vpop.f32.mrf.mxu3 }
 0x1b6   :  { %v343_v48 = vpop.f32.mrf.mxu1 }
 0x1b7   :  { %v344_v0 = vadd.f32 %v343_v48, %v320_v9  ;;  %399 = vperm.xlu0 %1220, %v393_v36   ;;  %v395_v54 = vmul.f32 %v393_v36, %v393_v36 }
 0x1b9   :  { %v367_v7 = vadd.f32 %v366_v31, %v344_v0 }
 0x1bb   :  { %v390_v39 = vadd.f32 %v389_v4, %v367_v7 }
 0x1bd   :  { %v394_v28 = vmul.f32 0.0025510204, %v390_v39 }
 0x1bf   :  { %v396_v5 = vsub.f32 %v394_v28, %v395_v54  ;;  %1465 = vset.pattern.permute.xlu0 %v2591_v14 }
 0x1c1   :  { %v406_v12 = vadd.f32 1e-05, %v396_v5 }
 0x1c3   :  { %1472 = vrsqrt.f32 %v406_v12  ;;  %vm413_vm11 = vweird.f32 %v406_v12 }
 0x1c9   :  { %v1473_v9 = vpop.eup %1472 }
 0x1ca   :  { %v408_v48 = vmul.f32 %v1473_v9, %v406_v12  ;;  %vm414_vm10 = vweird.f32 %v1473_v9 }
 0x1cb   :  { %vm415_vm12 = vmor %vm413_vm11, %vm414_vm10 }
 0x1cc   :  { %v409_v31 = vmul.f32 %v1473_v9, %v408_v48 }
 0x1ce   :  { %v410_v0 = vmul.f32 0.5, %v409_v31 }
 0x1d0   :  { %v411_v4 = vsub.f32 1.5, %v410_v0 }
 0x1d2   :  { %v412_v39 = vmul.f32 %v1473_v9, %v411_v4 }
 0x1d4   :  { %v416_v36 = vsel %vm415_vm12, %v1473_v9, %v412_v39  ;;  %v429_v9 = vpop.permute.xlu2 %428 }
 0x1d5   :  { %419 = vperm.xlu1 %1222, %v416_v36  }
 0x1dd   :  { %1223 = vset.pattern.permute.xlu1 %v2591_v14 }
 0x1de   :  { %436 = vperm.xlu1 %1223, %v2230_v21  }
 0x229   :  { %v400_v54 = vpop.permute.xlu0 %399 }
 0x22a   :  { %v402_v35 = vsub.f32 %v2204_v10, %v400_v54  ;;  %v403_v6 = vsub.f32 %v2206_v34, %v400_v54  ;;  %v404_v28 = vsub.f32 %v2196_v51, %v400_v54  ;;  %v405_v11 = vsub.f32 %v2201_v1, %v400_v54 }
 0x247   :  { %v420_v7 = vpop.permute.xlu1 %419 }
 0x248   :  { %v422_v61 = vmul.f32 %v420_v7, %v402_v35  ;;  %v423_v5 = vmul.f32 %v420_v7, %v403_v6  ;;  %v424_v12 = vmul.f32 %v420_v7, %v404_v28  ;;  %v425_v48 = vmul.f32 %v420_v7, %v405_v11 }
 0x249   :  { %v2622_v28 = vpack.i.bf16 %v1720_v24, %v1715_v23  ;;  %v2623_v11 = vpack.i.bf16 %v1703_v19, %v1698_v18  ;;  %v2626_v23 = vpack.i.bf16 %v1755_v32, %v1731_v27  ;;  %v2627_v18 = vpack.i.bf16 %v1808_v50, %v1799_v45 }
 0x24a   :  { %v431_v31 = vmul.f32 %v429_v9, %v422_v61  ;;  %v432_v0 = vmul.f32 %v429_v9, %v423_v5  ;;  %v433_v4 = vmul.f32 %v429_v9, %v424_v12  ;;  %v434_v39 = vmul.f32 %v429_v9, %v425_v48  ;;  %v2654_v12 = vld [vmem:[#allocation23_spill] sm:$0xff]  ;;  %v2656_v9 = vld [vmem:[#allocation10_spill] sm:$0xff] }
 0x24b   :  { %v2624_v61 = vpack.i.bf16 %v1726_v26, %v1760_v33  ;;  %v2625_v5 = vpack.i.bf16 %v1710_v22, %v1738_v29  ;;  %v2628_v19 = vpack.i.bf16 %v1778_v40, %v1769_v37  ;;  %v2629_v22 = vpack.i.bf16 %v1748_v30, %v1783_v41 }
 0x24c   :  { %v2630_v24 = vpack.i.bf16 %v1813_v52, %v1843_v62  ;;  %v2631_v26 = vpack.i.bf16 %v1794_v44, %v1825_v57  ;;  %v2632_v27 = vpack.i.bf16 %v1838_v60, %v1818_v53  ;;  %v2633_v29 = vpack.i.bf16 %v1878_v42, %v1869_v17  ;;  %v2641_v57 = vld [vmem:[#allocation13_spill] sm:$0xff]  ;;  %v2643_v60 = vld [vmem:[#allocation8_spill] sm:$0xff] }
 0x24d   :  { %v2634_v30 = vpack.i.bf16 %v1857_v13, %v1848_v8  ;;  %v2635_v32 = vpack.i.bf16 %v1831_v58, %v1862_v15  ;;  %v2636_v33 = vpack.i.bf16 %v1929_v46, %v1946_v3  ;;  %v2637_v37 = vpack.i.bf16 %v1884_v43, %v1891_v20  ;;  %v2642_v58 = vld [vmem:[#allocation6_spill] sm:$0xff]  ;;  %v2644_v62 = vld [vmem:[#allocation12_spill] sm:$0xff] }
 0x24e   :  { %v2638_v40 = vpack.i.bf16 %v1903_v59, %v1896_v25  ;;  %v1399_v41 = vpack.i.bf16 %v2065_v47, %v2029_v63  ;;  %v2639_v44 = vpack.i.bf16 %v1951_v16, %v1939_v56  ;;  %v2640_v45 = vpack.i.bf16 %v1934_v49, %v1956_v38  ;;  %v2646_v25 = vld [vmem:[#allocation9_spill] sm:$0xff]  ;;  %v2647_v42 = vld [vmem:[#allocation16_spill] sm:$0xff]  ;;  %v2649_v56 = vld [vmem:[#allocation7_spill] sm:$0xff] }
 0x24f   :  { %v1404_v53 = vpack.i.bf16 %v2011_v2, %v2070_v55  ;;  %v1414_v59 = vpack.i.bf16 %v2642_v58, %v2641_v57  ;;  %v1409_v8 = vpack.i.bf16 %v2644_v62, %v2643_v60  ;;  %v1419_v43 = vpack.i.bf16 %v2647_v42, %v2646_v25  ;;  %v2648_v49 = vld [vmem:[#allocation17_spill] sm:$0xff]  ;;  %v2650_v16 = vld [vmem:[#allocation19_spill] sm:$0xff]  ;;  %v2653_v55 = vld [vmem:[#allocation14_spill] sm:$0xff] }
 0x250   :  { %v437_v36 = vpop.permute.xlu1 %436  ;;  %v1424_v3 = vpack.i.bf16 %v2649_v56, %v2648_v49  ;;  %v2651_v2 = vld [vmem:[#allocation11_spill] sm:$0xff]  ;;  %v2655_v48 = vpack.i.bf16 %v2653_v55, %v2654_v12  ;;  %v2666_v57 = vld [vmem:[#allocation25_spill] sm:$0xff] }
 0x251   :  { %v2240_v14 = vadd.f32 %v437_v36, %v431_v31  ;;  %v2242_v21 = vadd.f32 %v437_v36, %v432_v0  ;;  %v2244_v10 = vadd.f32 %v437_v36, %v433_v4  ;;  %v2246_v34 = vadd.f32 %v437_v36, %v434_v39  ;;  %v2657_v31 = vld [vmem:[#allocation20_spill] sm:$0xff]  ;;  %v2659_v36 = vld [vmem:[#allocation22_spill] sm:$0xff] }
 0x252   :  { %v2652_v63 = vpack.i.bf16 %v2650_v16, %v2651_v2  ;;  %v2658_v0 = vpack.i.bf16 %v2656_v9, %v2657_v31 }
 0x253   :  { %v443_v1 = vmax.f32 %v2240_v14, 0.0  ;;  %v444_v51 = vmax.f32 %v2242_v21, 0.0  ;;  %v445_v54 = vmax.f32 %v2244_v10, 0.0  ;;  %v446_v7 = vmax.f32 %v2246_v34, 0.0 }
 0x255   :  { %v1234_v35 = vpack.i.bf16 %v446_v7, %v445_v54  ;;  %v1229_v6 = vpack.i.bf16 %v444_v51, %v443_v1 }
 0x257   :  { %1235 = vrot.lane.b32.xlu1 %v1234_v35, %s1505_s26  ;;  %1225 = vrot.lane.b32.xlu2 %v1234_v35, %s1506_s27 }
 0x258   :  { %1230 = vrot.lane.b32.xlu0 %v1229_v6, %s1506_s27 }
 0x25f   :  { %1240 = vrot.lane.b32.xlu2 %v1234_v35, %s1507_s28  ;;  %1250 = vrot.lane.b32.xlu1 %v1229_v6, %s1507_s28 }
 0x260   :  { %1245 = vrot.lane.b32.xlu0 %v1229_v6, %s1505_s26 }
 0x267   :  { %1255 = vrot.lane.b32.xlu2 %v1234_v35, %s1509_s29  ;;  %1265 = vrot.lane.b32.xlu1 %v1229_v6, %s1509_s29 }
 0x268   :  { %1260 = vrot.lane.b32.xlu0 %v1234_v35, %s1508_s0 }
 0x26f   :  { %1270 = vrot.lane.b32.xlu2 %v1229_v6, %s1508_s0  ;;  %1280 = vrot.lane.b32.xlu1 %v1234_v35, %s1511_s6 }
 0x270   :  { %1275 = vrot.lane.b32.xlu0 %v1234_v35, %s1510_s30 }
 0x277   :  { %1285 = vrot.lane.b32.xlu2 %v1229_v6, %s1510_s30  ;;  %1295 = vrot.lane.b32.xlu1 %v1234_v35, %s1512_s7  ;;  %v2660_v35 = vld [vmem:[#allocation15_spill] sm:$0xff] }
 0x278   :  { %1290 = vrot.lane.b32.xlu0 %v1229_v6, %s1511_s6  ;;  %s1128_s6 = sshll.u32 %s2561_s5, 4  ;;  %s1129_s6 = int_to_ptr.hbm [resolvable:$true] %s1128_s6 }
 0x27f   :  { %1300 = vrot.lane.b32.xlu2 %v1229_v6, %s1512_s7  ;;  %1310 = vrot.lane.b32.xlu1 %v2622_v28, %s1512_s7  ;;  %v2661_v6 = vpack.i.bf16 %v2659_v36, %v2660_v35 }
 0x280   :  { %1305 = vrot.lane.b32.xlu0 %v2623_v11, %s1512_s7 }
 0x287   :  { %1325 = vrot.lane.b32.xlu1 %v2624_v61, %s1512_s7  ;;  %1315 = vrot.lane.b32.xlu2 %v2625_v5, %s1512_s7 }
 0x288   :  { %1320 = vrot.lane.b32.xlu0 %v2626_v23, %s1512_s7 }
 0x28f   :  { %1340 = vrot.lane.b32.xlu1 %v2627_v18, %s1512_s7  ;;  %1330 = vrot.lane.b32.xlu2 %v2628_v19, %s1512_s7 }
 0x290   :  { %1335 = vrot.lane.b32.xlu0 %v2629_v22, %s1512_s7 }
 0x297   :  { %1355 = vrot.lane.b32.xlu1 %v2630_v24, %s1512_s7  ;;  %1345 = vrot.lane.b32.xlu2 %v2631_v26, %s1512_s7 }
 0x298   :  { %1350 = vrot.lane.b32.xlu0 %v2632_v27, %s1512_s7 }
 0x29f   :  { %1370 = vrot.lane.b32.xlu1 %v2633_v29, %s1512_s7  ;;  %1360 = vrot.lane.b32.xlu2 %v2634_v30, %s1512_s7 }
 0x2a0   :  { %1365 = vrot.lane.b32.xlu0 %v2635_v32, %s1512_s7 }
 0x2a7   :  { %1385 = vrot.lane.b32.xlu1 %v2636_v33, %s1512_s7  ;;  %1375 = vrot.lane.b32.xlu2 %v2637_v37, %s1512_s7 }
 0x2a8   :  { %1380 = vrot.lane.b32.xlu0 %v2638_v40, %s1512_s7  ;;  %v2662_v40 = vld [vmem:[#allocation27_spill] sm:$0xff] }
 0x2af   :  { %1400 = vrot.lane.b32.xlu1 %v1399_v41, %s1512_s7  ;;  %1390 = vrot.lane.b32.xlu2 %v2639_v44, %s1512_s7  ;;  %v2663_v41 = vld [vmem:[#allocation26_spill] sm:$0xff] }
 0x2b0   :  { %1395 = vrot.lane.b32.xlu0 %v2640_v45, %s1512_s7  ;;  %v2664_v44 = vpack.i.bf16 %v2662_v40, %v2663_v41 }
 0x2b1   :  { %v1226_v46 = vpop.permute.xlu2 %1225 }
 0x2b2   :  { %v1228_v50 = vunpack.i.h.bf16 %v1226_v46  ;;  %v1227_v52 = vunpack.i.l.bf16 %v1226_v46 }
 0x2b4   :  { %v539_v15 = vsel %vm127_vm0, %v1227_v52, %v1228_v50 }
 0x2b5   :  { %v561_v17 = vpack.c.bf16 %v539_v15, %v539_v15 }
 0x2b7   :  { %v574_v20 = vsel %vm163_vm1, %v561_v17, 0  ;;  %1415 = vrot.lane.b32.xlu1 %v1414_v59, %s1512_s7  ;;  %1405 = vrot.lane.b32.xlu2 %v1404_v53, %s1512_s7  ;;  %v2669_v59 = vld [vmem:[#allocation18_spill] sm:$0xff] }
 0x2b8   :  { %608 = vmatpush.bf16.msra.mxu2 %v574_v20  ;;  %1410 = vrot.lane.b32.xlu0 %v1409_v8, %s1512_s7 }
 0x2b9   :  { %v1241_v38 = vpop.permute.xlu2 %1240 }
 0x2ba   :  { %v1243_v4 = vunpack.i.h.bf16 %v1241_v38  ;;  %v1242_v39 = vunpack.i.l.bf16 %v1241_v38 }
 0x2bc   :  { %v527_v24 = vsel %vm114_vm3, %v1242_v39, %v1243_v4 }
 0x2bf   :  { %1430 = vrot.lane.b32.xlu1 %v2652_v63, %s1512_s7  ;;  %1420 = vrot.lane.b32.xlu2 %v1419_v43, %s1512_s7 }
 0x2c0   :  { %1425 = vrot.lane.b32.xlu0 %v1424_v3, %s1512_s7 }
 0x2c1   :  { %v2377_v47 = vpop.permute.xlu2 %1255 }
 0x2c2   :  { %v1258_v12 = vunpack.i.h.bf16 %v2377_v47 }
 0x2c7   :  { %1445 = vrot.lane.b32.xlu1 %v2655_v48, %s1512_s7  ;;  %1435 = vrot.lane.b32.xlu2 %v2658_v0, %s1512_s7  ;;  %v1257_v48 = vunpack.i.l.bf16 %v2377_v47 }
 0x2c8   :  { %1440 = vrot.lane.b32.xlu0 %v2661_v6, %s1512_s7 }
 0x2c9   :  { %v1236_v28 = vpop.permute.xlu1 %1235  ;;  %v2391_v11 = vpop.permute.xlu2 %1270 }
 0x2ca   :  { %v1238_v61 = vunpack.i.h.bf16 %v1236_v28  ;;  %v1237_v5 = vunpack.i.l.bf16 %v1236_v28  ;;  %v1231_v23 = vpop.permute.xlu0 %1230  ;;  %v1273_v9 = vunpack.i.h.bf16 %v2391_v11  ;;  %v1272_v31 = vunpack.i.l.bf16 %v2391_v11 }
 0x2cb   :  { %v1233_v18 = vunpack.i.h.bf16 %v1231_v23  ;;  %v1232_v19 = vunpack.i.l.bf16 %v1231_v23 }
 0x2cc   :  { %v515_v22 = vsel %vm101_vm2, %v1237_v5, %v1238_v61  ;;  %v505_v11 = vsel %vm88_vm4, %v1272_v31, %v1273_v9 }
 0x2cd   :  { %v557_v26 = vpack.c.bf16 %v527_v24, %v515_v22  ;;  %v541_v27 = vsel %vm127_vm0, %v1232_v19, %v1233_v18  ;;  %v540_v29 = vsel %vm127_vm0, %v1233_v18, %v1227_v52  ;;  %v542_v30 = vsel %vm127_vm0, %v1228_v50, %v1232_v19  ;;  %v2665_v52 = vld [vmem:[#allocation21_spill] sm:$0xff]  ;;  %v2668_v50 = vld [vmem:[#allocation24_spill] sm:$0xff] }
 0x2ce   :  { %v559_v32 = vpack.c.bf16 %v541_v27, %v541_v27  ;;  %v560_v33 = vpack.c.bf16 %v540_v29, %v540_v29  ;;  %v562_v37 = vpack.c.bf16 %v542_v30, %v542_v30  ;;  %v2667_v58 = vpack.i.bf16 %v2665_v52, %v2666_v57 }
 0x2cf   :  { %609 = vmatpush.bf16.msra.mxu2 %v557_v26  ;;  %1460 = vrot.lane.b32.xlu1 %v2664_v44, %s1512_s7  ;;  %v2670_v60 = vpack.i.bf16 %v2668_v50, %v2669_v59 }
 0x2d0   :  { %v568_v45 = vsel %vm163_vm1, %v559_v32, 0  ;;  %v571_v46 = vsel %vm163_vm1, %v560_v33, 0  ;;  %v577_v53 = vsel %vm163_vm1, %v562_v37, 0  ;;  %1455 = vrot.lane.b32.xlu0 %v2667_v58, %s1512_s7 }
 0x2d1   :  { %1450 = vrot.lane.b32.xlu2 %v2670_v60, %s1512_s7  ;;  %582 = vmatpush.bf16.msra.mxu0 %v568_v45  ;;  %v2418_v62 = vpop.permute.xlu2 %1285  ;;  %v1251_v8 = vpop.permute.xlu1 %1250 }
 0x2d2   :  { %595 = vmatpush.bf16.msra.mxu1 %v571_v46  ;;  %621 = vmatpush.bf16.msra.mxu3 %v577_v53  ;;  %v1253_v15 = vunpack.i.h.bf16 %v1251_v8  ;;  %v1252_v17 = vunpack.i.l.bf16 %v1251_v8  ;;  %v1246_v20 = vpop.permute.xlu0 %1245  ;;  %v1288_v52 = vunpack.i.h.bf16 %v2418_v62  ;;  %v1287_v57 = vunpack.i.l.bf16 %v2418_v62 }
 0x2d3   :  { %v1248_v38 = vunpack.i.h.bf16 %v1246_v20  ;;  %v1247_v25 = vunpack.i.l.bf16 %v1246_v20 }
 0x2d4   :  { %v529_v42 = vsel %vm114_vm3, %v1252_v17, %v1253_v15  ;;  %v528_v43 = vsel %vm114_vm3, %v1253_v15, %v1242_v39  ;;  %v530_v49 = vsel %vm114_vm3, %v1243_v4, %v1252_v17 }
 0x2d5   :  { %v517_v56 = vsel %vm101_vm2, %v1247_v25, %v1248_v38  ;;  %v516_v3 = vsel %vm101_vm2, %v1248_v38, %v1237_v5  ;;  %v518_v16 = vsel %vm101_vm2, %v1238_v61, %v1247_v25  ;;  %v491_v61 = vsel %vm75_vm5, %v1257_v48, %v1258_v12 }
 0x2d6   :  { %v555_v2 = vpack.c.bf16 %v529_v42, %v517_v56  ;;  %v556_v63 = vpack.c.bf16 %v528_v43, %v516_v3  ;;  %v558_v55 = vpack.c.bf16 %v530_v49, %v518_v16  ;;  %v469_v25 = vsel %vm49_vm7, %v1287_v57, %v1288_v52 }
 0x2d8   :  { %583 = vmatpush.bf16.msra.mxu0 %v555_v2  ;;  %596 = vmatpush.bf16.msra.mxu1 %v556_v63 }
 0x2d9   :  { %622 = vmatpush.bf16.msra.mxu3 %v558_v55  ;;  %v2436_v0 = vpop.permute.xlu2 %1300  ;;  %v1266_v4 = vpop.permute.xlu1 %1265 }
 0x2da   :  { %v1268_v39 = vunpack.i.h.bf16 %v1266_v4  ;;  %v1267_v36 = vunpack.i.l.bf16 %v1266_v4  ;;  %v1261_v35 = vpop.permute.xlu0 %1260  ;;  %v1303_v15 = vunpack.i.h.bf16 %v2436_v0  ;;  %v1302_v17 = vunpack.i.l.bf16 %v2436_v0 }
 0x2db   :  { %v1263_v6 = vunpack.i.h.bf16 %v1261_v35  ;;  %v1262_v28 = vunpack.i.l.bf16 %v1261_v35 }
 0x2dc   :  { %v493_v47 = vsel %vm75_vm5, %v1267_v36, %v1268_v39  ;;  %v492_v5 = vsel %vm75_vm5, %v1268_v39, %v1257_v48  ;;  %v494_v23 = vsel %vm75_vm5, %v1258_v12, %v1267_v36  ;;  %v563_v12 = vld [vmem:[%s2558_s2] sm:$0xf]  ;;  %v457_v48 = vsel %vm36_vm8, %v1302_v17, %v1303_v15 }
 0x2dd   :  { %v551_v18 = vpack.c.bf16 %v505_v11, %v493_v47  ;;  %v504_v19 = vsel %vm88_vm4, %v1273_v9, %v1262_v28  ;;  %v503_v22 = vsel %vm88_vm4, %v1262_v28, %v1263_v6  ;;  %v506_v24 = vsel %vm88_vm4, %v1263_v6, %v1272_v31 }
 0x2de   :  { %v552_v26 = vpack.c.bf16 %v504_v19, %v492_v5  ;;  %v553_v27 = vpack.c.bf16 %v503_v22, %v491_v61  ;;  %v554_v29 = vpack.c.bf16 %v506_v24, %v494_v23  ;;  %v543_v31 = vpack.c.bf16 %v457_v48, %v443_v1 }
 0x2df   :  { %584 = vmatpush.bf16.msra.mxu0 %v551_v18 }
 0x2e0   :  { %597 = vmatpush.bf16.msra.mxu1 %v552_v26  ;;  %610 = vmatpush.bf16.msra.mxu2 %v553_v27 }
 0x2e1   :  { %623 = vmatpush.bf16.msra.mxu3 %v554_v29  ;;  %v1281_v30 = vpop.permute.xlu1 %1280  ;;  %v2454_v32 = vpop.permute.xlu2 %1315 }
 0x2e2   :  { %v1283_v33 = vunpack.i.h.bf16 %v1281_v30  ;;  %v1282_v37 = vunpack.i.l.bf16 %v1281_v30  ;;  %v1276_v40 = vpop.permute.xlu0 %1275  ;;  %v1317_v61 = vunpack.i.l.bf16 %v2454_v32  ;;  %v1318_v14 = vunpack.i.h.bf16 %v2454_v32 }
 0x2e3   :  { %v1278_v41 = vunpack.i.h.bf16 %v1276_v40  ;;  %v1277_v44 = vunpack.i.l.bf16 %v1276_v40 }
 0x2e4   :  { %v479_v45 = vsel %vm62_vm6, %v1282_v37, %v1283_v33 }
 0x2e5   :  { %v467_v46 = vsel %vm49_vm7, %v1277_v44, %v1278_v41  ;;  %v468_v42 = vsel %vm49_vm7, %v1288_v52, %v1277_v44  ;;  %v470_v43 = vsel %vm49_vm7, %v1278_v41, %v1287_v57 }
 0x2e6   :  { %v549_v53 = vpack.c.bf16 %v479_v45, %v467_v46 }
 0x2e8   :  { %611 = vmatpush.bf16.msra.mxu2 %v549_v53 }
 0x2e9   :  { %v1296_v58 = vpop.permute.xlu1 %1295  ;;  %v2462_v50 = vpop.permute.xlu2 %1330 }
 0x2ea   :  { %v1298_v59 = vunpack.i.h.bf16 %v1296_v58  ;;  %v1297_v60 = vunpack.i.l.bf16 %v1296_v58  ;;  %v1291_v8 = vpop.permute.xlu0 %1290  ;;  %v1333_v11 = vunpack.i.h.bf16 %v2462_v50  ;;  %v1332_v5 = vunpack.i.l.bf16 %v2462_v50 }
 0x2eb   :  { %v1293_v20 = vunpack.i.h.bf16 %v1291_v8  ;;  %v1292_v38 = vunpack.i.l.bf16 %v1291_v8 }
 0x2ec   :  { %v455_v62 = vsel %vm36_vm8, %v1297_v60, %v1298_v59  ;;  %v456_v9 = vsel %vm36_vm8, %v1303_v15, %v1297_v60  ;;  %v458_v10 = vsel %vm36_vm8, %v1298_v59, %v1302_v17 }
 0x2ed   :  { %v481_v49 = vsel %vm62_vm6, %v1292_v38, %v1293_v20  ;;  %v480_v56 = vsel %vm62_vm6, %v1293_v20, %v1282_v37  ;;  %v545_v3 = vpack.c.bf16 %v455_v62, %v445_v54  ;;  %v482_v16 = vsel %vm62_vm6, %v1283_v33, %v1292_v38 }
 0x2ee   :  { %v547_v2 = vpack.c.bf16 %v481_v49, %v469_v25  ;;  %v548_v63 = vpack.c.bf16 %v480_v56, %v468_v42  ;;  %v550_v55 = vpack.c.bf16 %v482_v16, %v470_v43  ;;  %v544_v0 = vpack.c.bf16 %v456_v9, %v444_v51 }
 0x2ef   :  { %612 = vmatpush.bf16.msra.mxu2 %v545_v3  ;;  %v546_v6 = vpack.c.bf16 %v458_v10, %v446_v7 }
 0x2f0   :  { %585 = vmatpush.bf16.msra.mxu0 %v547_v2  ;;  %598 = vmatpush.bf16.msra.mxu1 %v548_v63 }
 0x2f1   :  { %624 = vmatpush.bf16.msra.mxu3 %v550_v55  ;;  %v1311_v54 = vpop.permute.xlu1 %1310  ;;  %v1346_v35 = vpop.permute.xlu2 %1345 }
 0x2f2   :  { %1147 = vmatmul.msk.bf16.vlgmr.msra.gmra.mxu2 %vm159_vm9, %v563_v12  ;;  %v1306_v4 = vpop.permute.xlu0 %1305  ;;  %v1313_v39 = vunpack.i.h.bf16 %v1311_v54  ;;  %v1312_v36 = vunpack.i.l.bf16 %v1311_v54  ;;  %v1348_v29 = vunpack.i.h.bf16 %v1346_v35  ;;  %v1347_v30 = vunpack.i.l.bf16 %v1346_v35 }
 0x2f3   :  { %v1307_v28 = vunpack.i.l.bf16 %v1306_v4  ;;  %v1308_v13 = vunpack.i.h.bf16 %v1306_v4 }
 0x2f4   :  { %586 = vmatpush.bf16.msra.mxu0 %v543_v31  ;;  %599 = vmatpush.bf16.msra.mxu1 %v544_v0 }
 0x2f5   :  { %625 = vmatpush.bf16.msra.mxu3 %v546_v6  ;;  %953 = vmatpush.msrb.mxu2 %v1307_v28 }
 0x2f7   :  { %1145 = vmatmul.msk.bf16.vlgmr.msra.gmra.mxu0 %vm159_vm9, %v563_v12  ;;  %1146 = vmatmul.msk.bf16.vlgmr.msra.gmra.mxu1 %vm159_vm9, %v563_v12 }
 0x2f8   :  { %895 = vmatpush.msrb.mxu0 %v1313_v39  ;;  %1148 = vmatmul.msk.bf16.vlgmr.msra.gmra.mxu3 %vm159_vm9, %v563_v12 }
 0x2f9   :  { %982 = vmatpush.msrb.mxu3 %v1312_v36  ;;  %954 = vmatpush.msrb.mxu2 %v1308_v13  ;;  %v1326_v21 = vpop.permute.xlu1 %1325  ;;  %v1361_v23 = vpop.permute.xlu2 %1360 }
 0x2fa   :  { %924 = vmatpush.msrb.mxu1 %v1317_v61  ;;  %v1321_v34 = vpop.permute.xlu0 %1320  ;;  %v1328_v1 = vunpack.i.h.bf16 %v1326_v21  ;;  %v1327_v51 = vunpack.i.l.bf16 %v1326_v21  ;;  %v1363_v46 = vunpack.i.h.bf16 %v1361_v23  ;;  %v1362_v53 = vunpack.i.l.bf16 %v1361_v23 }
 0x2fb   :  { %955 = vmatpush.msrb.mxu2 %v1318_v14  ;;  %v1323_v7 = vunpack.i.h.bf16 %v1321_v34  ;;  %v1322_v47 = vunpack.i.l.bf16 %v1321_v34 }
 0x2fc   :  { %925 = vmatpush.msrb.mxu1 %v1327_v51 }
 0x2fd   :  { %956 = vmatpush.msrb.mxu2 %v1328_v1  ;;  %896 = vmatpush.msrb.mxu0 %v1323_v7 }
 0x2fe   :  { %983 = vmatpush.msrb.mxu3 %v1322_v47 }
 0x2ff   :  { %897 = vmatpush.msrb.mxu0 %v1333_v11 }
 0x300   :  { %984 = vmatpush.msrb.mxu3 %v1332_v5 }
 0x301   :  { %v1341_v18 = vpop.permute.xlu1 %1340  ;;  %v1376_v32 = vpop.permute.xlu2 %1375 }
 0x302   :  { %v1336_v19 = vpop.permute.xlu0 %1335  ;;  %v1343_v22 = vunpack.i.h.bf16 %v1341_v18  ;;  %v1342_v24 = vunpack.i.l.bf16 %v1341_v18  ;;  %v1378_v15 = vunpack.i.h.bf16 %v1376_v32  ;;  %v1377_v17 = vunpack.i.l.bf16 %v1376_v32 }
 0x303   :  { %v1338_v26 = vunpack.i.h.bf16 %v1336_v19  ;;  %v1337_v27 = vunpack.i.l.bf16 %v1336_v19 }
 0x304   :  { %898 = vmatpush.msrb.mxu0 %v1343_v22  ;;  %985 = vmatpush.msrb.mxu3 %v1342_v24 }
 0x305   :  { %926 = vmatpush.msrb.mxu1 %v1337_v27  ;;  %957 = vmatpush.msrb.mxu2 %v1338_v26 }
 0x307   :  { %927 = vmatpush.msrb.mxu1 %v1347_v30  ;;  %958 = vmatpush.msrb.mxu2 %v1348_v29 }
 0x309   :  { %v1356_v33 = vpop.permute.xlu1 %1355  ;;  %v1391_v52 = vpop.permute.xlu2 %1390 }
 0x30a   :  { %v1351_v37 = vpop.permute.xlu0 %1350  ;;  %v1358_v40 = vunpack.i.h.bf16 %v1356_v33  ;;  %v1357_v41 = vunpack.i.l.bf16 %v1356_v33  ;;  %v1393_v56 = vunpack.i.h.bf16 %v1391_v52  ;;  %v1392_v3 = vunpack.i.l.bf16 %v1391_v52 }
 0x30b   :  { %v1353_v44 = vunpack.i.h.bf16 %v1351_v37  ;;  %v1352_v45 = vunpack.i.l.bf16 %v1351_v37 }
 0x30c   :  { %928 = vmatpush.msrb.mxu1 %v1357_v41  ;;  %959 = vmatpush.msrb.mxu2 %v1358_v40 }
 0x30d   :  { %899 = vmatpush.msrb.mxu0 %v1353_v44  ;;  %986 = vmatpush.msrb.mxu3 %v1352_v45 }
 0x30f   :  { %900 = vmatpush.msrb.mxu0 %v1363_v46  ;;  %987 = vmatpush.msrb.mxu3 %v1362_v53 }
 0x311   :  { %v1371_v57 = vpop.permute.xlu1 %1370  ;;  %v1406_v62 = vpop.permute.xlu2 %1405 }
 0x312   :  { %v1366_v58 = vpop.permute.xlu0 %1365  ;;  %v1373_v50 = vunpack.i.h.bf16 %v1371_v57  ;;  %v1372_v59 = vunpack.i.l.bf16 %v1371_v57  ;;  %v1408_v9 = vunpack.i.h.bf16 %v1406_v62  ;;  %v1407_v10 = vunpack.i.l.bf16 %v1406_v62 }
 0x313   :  { %v1368_v60 = vunpack.i.h.bf16 %v1366_v58  ;;  %v1367_v8 = vunpack.i.l.bf16 %v1366_v58 }
 0x314   :  { %901 = vmatpush.msrb.mxu0 %v1373_v50  ;;  %988 = vmatpush.msrb.mxu3 %v1372_v59 }
 0x315   :  { %929 = vmatpush.msrb.mxu1 %v1367_v8  ;;  %960 = vmatpush.msrb.mxu2 %v1368_v60 }
 0x317   :  { %930 = vmatpush.msrb.mxu1 %v1377_v17  ;;  %961 = vmatpush.msrb.mxu2 %v1378_v15  ;;  %v2671_v15 = vld [vmem:[#allocation29_spill] sm:$0xff]  ;;  %v2672_v17 = vld [vmem:[#allocation30_spill] sm:$0xff] }
 0x319   :  { %v1386_v20 = vpop.permute.xlu1 %1385  ;;  %v1421_v54 = vpop.permute.xlu2 %1420 }
 0x31a   :  { %v1381_v38 = vpop.permute.xlu0 %1380  ;;  %v1388_v25 = vunpack.i.h.bf16 %v1386_v20  ;;  %v1387_v42 = vunpack.i.l.bf16 %v1386_v20  ;;  %v1423_v6 = vunpack.i.h.bf16 %v1421_v54  ;;  %v1422_v28 = vunpack.i.l.bf16 %v1421_v54  ;;  %v2673_v20 = vld [vmem:[#allocation28_spill] sm:$0xff] }
 0x31b   :  { %v1383_v43 = vunpack.i.h.bf16 %v1381_v38  ;;  %v1382_v49 = vunpack.i.l.bf16 %v1381_v38  ;;  %v635_v38 = vmul.f32 %v2671_v15, %v2671_v15  ;;  %v637_v62 = vmul.f32 %v2673_v20, %v2673_v20 }
 0x31c   :  { %931 = vmatpush.msrb.mxu1 %v1387_v42  ;;  %962 = vmatpush.msrb.mxu2 %v1388_v25  ;;  %v636_v25 = vmul.f32 %v2672_v17, %v2672_v17  ;;  %v2674_v42 = vld [vmem:[#allocation31_spill] sm:$0xff] }
 0x31d   :  { %902 = vmatpush.msrb.mxu0 %v1383_v43  ;;  %989 = vmatpush.msrb.mxu3 %v1382_v49  ;;  %v638_v43 = vmul.f32 %v2674_v42, %v2674_v42 }
 0x31f   :  { %903 = vmatpush.msrb.mxu0 %v1393_v56  ;;  %990 = vmatpush.msrb.mxu3 %v1392_v3 }
 0x321   :  { %v1401_v16 = vpop.permute.xlu1 %1400  ;;  %v1436_v13 = vpop.permute.xlu2 %1435 }
 0x322   :  { %v1396_v2 = vpop.permute.xlu0 %1395  ;;  %v1403_v63 = vunpack.i.h.bf16 %v1401_v16  ;;  %v1402_v55 = vunpack.i.l.bf16 %v1401_v16  ;;  %v1438_v7 = vunpack.i.h.bf16 %v1436_v13  ;;  %v1437_v47 = vunpack.i.l.bf16 %v1436_v13 }
 0x323   :  { %v1398_v12 = vunpack.i.h.bf16 %v1396_v2  ;;  %v1397_v48 = vunpack.i.l.bf16 %v1396_v2  ;;  %v1515_v2 = vmov 2  }
 0x324   :  { %904 = vmatpush.msrb.mxu0 %v1403_v63  ;;  %991 = vmatpush.msrb.mxu3 %v1402_v55  ;;  %v2675_v63 = vld [vmem:[#allocation32_spill] sm:$0xff] }
 0x325   :  { %932 = vmatpush.msrb.mxu1 %v1397_v48  ;;  %963 = vmatpush.msrb.mxu2 %v1398_v12 }
 0x326   :  { %1464 = vset.pattern.permute.xlu1 %v1515_v2 }
 0x327   :  { %933 = vmatpush.msrb.mxu1 %v1407_v10  ;;  %964 = vmatpush.msrb.mxu2 %v1408_v9 }
 0x328   :  { %1045 = vperm.xlu1 %1464, %v2675_v63  }
 0x329   :  { %v1416_v31 = vpop.permute.xlu1 %1415 }
 0x32a   :  { %v1411_v0 = vpop.permute.xlu0 %1410  ;;  %v1418_v4 = vunpack.i.h.bf16 %v1416_v31  ;;  %v1417_v39 = vunpack.i.l.bf16 %v1416_v31 }
 0x32b   :  { %v1413_v36 = vunpack.i.h.bf16 %v1411_v0  ;;  %v1412_v35 = vunpack.i.l.bf16 %v1411_v0  ;;  %v1451_v11 = vpop.permute.xlu2 %1450  ;;  %v2676_v0 = vmov 0  }
 0x32c   :  { %934 = vmatpush.msrb.mxu1 %v1417_v39  ;;  %965 = vmatpush.msrb.mxu2 %v1418_v4  ;;  %v1453_v26 = vunpack.i.h.bf16 %v1451_v11  ;;  %v1452_v27 = vunpack.i.l.bf16 %v1451_v11 }
 0x32d   :  { %905 = vmatpush.msrb.mxu0 %v1413_v36  ;;  %992 = vmatpush.msrb.mxu3 %v1412_v35 }
 0x32f   :  { %906 = vmatpush.msrb.mxu0 %v1423_v6  ;;  %993 = vmatpush.msrb.mxu3 %v1422_v28 }
 0x330   :  { %1466 = vset.pattern.permute.xlu1 %v2676_v0 }
 0x331   :  { %v1431_v61 = vpop.permute.xlu1 %1430 }
 0x332   :  { %v1426_v14 = vpop.permute.xlu0 %1425  ;;  %v1433_v21 = vunpack.i.h.bf16 %v1431_v61  ;;  %v1432_v34 = vunpack.i.l.bf16 %v1431_v61 }
 0x333   :  { %v1428_v1 = vunpack.i.h.bf16 %v1426_v14  ;;  %v1427_v51 = vunpack.i.l.bf16 %v1426_v14 }
 0x334   :  { %907 = vmatpush.msrb.mxu0 %v1433_v21  ;;  %994 = vmatpush.msrb.mxu3 %v1432_v34 }
 0x335   :  { %935 = vmatpush.msrb.mxu1 %v1427_v51  ;;  %966 = vmatpush.msrb.mxu2 %v1428_v1  ;;  %v2677_v1 = vmov 1  }
 0x337   :  { %936 = vmatpush.msrb.mxu1 %v1437_v47  ;;  %967 = vmatpush.msrb.mxu2 %v1438_v7 }
 0x339   :  { %v1446_v5 = vpop.permute.xlu1 %1445 }
 0x33a   :  { %v1441_v23 = vpop.permute.xlu0 %1440  ;;  %v1448_v18 = vunpack.i.h.bf16 %v1446_v5  ;;  %v1447_v19 = vunpack.i.l.bf16 %v1446_v5 }
 0x33b   :  { %v1443_v22 = vunpack.i.h.bf16 %v1441_v23  ;;  %v1442_v24 = vunpack.i.l.bf16 %v1441_v23 }
 0x33c   :  { %937 = vmatpush.msrb.mxu1 %v1447_v19  ;;  %968 = vmatpush.msrb.mxu2 %v1448_v18 }
 0x33d   :  { %908 = vmatpush.msrb.mxu0 %v1443_v22  ;;  %995 = vmatpush.msrb.mxu3 %v1442_v24 }
 0x33f   :  { %909 = vmatpush.msrb.mxu0 %v1453_v26  ;;  %996 = vmatpush.msrb.mxu3 %v1452_v27 }
 0x341   :  { %v1461_v29 = vpop.permute.xlu1 %1460 }
 0x342   :  { %v1456_v30 = vpop.permute.xlu0 %1455  ;;  %v1462_v32 = vunpack.i.l.bf16 %v1461_v29  ;;  %v1463_v40 = vunpack.i.h.bf16 %v1461_v29 }
 0x343   :  { %v1458_v33 = vunpack.i.h.bf16 %v1456_v30  ;;  %v1457_v37 = vunpack.i.l.bf16 %v1456_v30 }
 0x344   :  { %910 = vmatpush.msrb.mxu0 %v1462_v32 }
 0x345   :  { %938 = vmatpush.msrb.mxu1 %v1457_v37  ;;  %997 = vmatpush.msrb.mxu3 %v1458_v33 }
 0x347   :  { %939 = vmatpush.msrb.mxu1 %v1463_v40 }
 0x374   :  { %v2505_v41 = vpop.f32.mrf.mxu0  ;;  %v2507_v44 = vpop.f32.mrf.mxu1 }
 0x375   :  { %911 = vmatmul.f32.vlgmr.msrb.gmra.mxu0 %v2505_v41  ;;  %940 = vmatmul.f32.vlgmr.msrb.gmra.mxu1 %v2507_v44  ;;  %v2511_v45 = vpop.f32.mrf.mxu2  ;;  %v631_v46 = vmul.f32 %v2505_v41, %v2505_v41  ;;  %v632_v53 = vmul.f32 %v2507_v44, %v2507_v44 }
 0x376   :  { %969 = vmatmul.f32.vlgmr.msrb.gmra.mxu2 %v2511_v45  ;;  %v633_v50 = vmul.f32 %v2511_v45, %v2511_v45 }
 0x37b   :  { %v2518_v52 = vpop.f32.mrf.mxu3 }
 0x37c   :  { %998 = vmatmul.f32.vlgmr.msrb.gmra.mxu3 %v2518_v52  ;;  %v590_v57 = vpop.f32.mrf.mxu0  ;;  %v603_v58 = vpop.f32.mrf.mxu1  ;;  %v634_v60 = vmul.f32 %v2518_v52, %v2518_v52 }
 0x37d   :  { %914 = vmatmul.f32.gmra.mxu0 %v631_v46  ;;  %943 = vmatmul.f32.gmra.mxu1 %v632_v53  ;;  %v616_v59 = vpop.f32.mrf.mxu2  ;;  %v1516_v53 = vmov 3  }
 0x37e   :  { %972 = vmatmul.f32.gmra.mxu2 %v633_v50 }
 0x383   :  { %v629_v8 = vpop.f32.mrf.mxu3 }
 0x384   :  { %1001 = vmatmul.f32.gmra.mxu3 %v634_v60  ;;  %v1517_v60 = vmov 5  }
 0x385   :  { %917 = vmatmul.f32.gmra.mxu0 %v2671_v15  ;;  %946 = vmatmul.f32.gmra.mxu1 %v2672_v17 }
 0x386   :  { %975 = vmatmul.f32.gmra.mxu2 %v2673_v20 }
 0x38c   :  { %1004 = vmatmul.f32.gmra.mxu3 %v2674_v42 }
 0x38d   :  { %920 = vmatmul.f32.gmra.mxu0 %v635_v38  ;;  %949 = vmatmul.f32.gmra.mxu1 %v636_v25 }
 0x38e   :  { %978 = vmatmul.f32.gmra.mxu2 %v637_v62 }
 0x394   :  { %1007 = vmatmul.f32.gmra.mxu3 %v638_v43 }
 0x3f2   :  { %v912_v49 = vpop.f32.mrf.mxu0  ;;  %v941_v56 = vpop.f32.mrf.mxu1 }
 0x3f3   :  { %v942_v3 = vadd.f32 %v941_v56, %v912_v49 }
 0x3f9   :  { %v970_v16 = vpop.f32.mrf.mxu2 }
 0x3fa   :  { %v915_v55 = vpop.f32.mrf.mxu0  ;;  %v971_v12 = vadd.f32 %v970_v16, %v942_v3  ;;  %v944_v48 = vpop.f32.mrf.mxu1  ;;  %v1518_v3 = vmov 4   ;;  %v1478_v16 = vld [vmem:[%s2559_s3] sm:$0xff]  ;;  %s1519_s3 = smov [#allocation2]  }
 0x3fb   :  { %v945_v4 = vadd.f32 %v944_v48, %v915_v55  ;;  %v1046_v55 = vpop.permute.xlu1 %1045  ;;  %s1126_s0 = sshll.u32 %s1519_s3, 4  ;;  %s1127_s0 = int_to_ptr.vmem [resolvable:$true] %s1126_s0 }
 0x3ff   :  { %v999_v9 = vpop.f32.mrf.mxu3 }
 0x400   :  { %v1000_v10 = vadd.f32 %v999_v9, %v971_v12 }
 0x401   :  { %v973_v54 = vpop.f32.mrf.mxu2 }
 0x402   :  { %v1011_v31 = vmul.f32 0.0034722222, %v1000_v10  ;;  %v918_v39 = vpop.f32.mrf.mxu0  ;;  %v974_v36 = vadd.f32 %v973_v54, %v945_v4  ;;  %v947_v35 = vpop.f32.mrf.mxu1 }
 0x403   :  { %v948_v21 = vadd.f32 %v947_v35, %v918_v39 }
 0x404   :  { %1017 = vperm.xlu2 %1221, %v1011_v31   ;;  %v1013_v61 = vmul.f32 %v1011_v31, %v1011_v31 }
 0x407   :  { %v1002_v6 = vpop.f32.mrf.mxu3 }
 0x408   :  { %v1003_v28 = vadd.f32 %v1002_v6, %v974_v36 }
 0x409   :  { %v976_v13 = vpop.f32.mrf.mxu2 }
 0x40a   :  { %v1012_v14 = vmul.f32 0.0034722222, %v1003_v28  ;;  %v977_v7 = vadd.f32 %v976_v13, %v948_v21  ;;  %v921_v5 = vpop.f32.mrf.mxu0  ;;  %v950_v23 = vpop.f32.mrf.mxu1 }
 0x40b   :  { %v951_v22 = vadd.f32 %v950_v23, %v921_v5 }
 0x40c   :  { %v1014_v34 = vsub.f32 %v1012_v14, %v1013_v61  ;;  %1467 = vset.pattern.permute.xlu2 %v2677_v1 }
 0x40e   :  { %v1024_v51 = vadd.f32 1e-05, %v1014_v34 }
 0x40f   :  { %v1005_v47 = vpop.f32.mrf.mxu3 }
 0x410   :  { %1474 = vrsqrt.f32 %v1024_v51  ;;  %v1006_v11 = vadd.f32 %v1005_v47, %v977_v7  ;;  %vm1031_vm14 = vweird.f32 %v1024_v51 }
 0x411   :  { %v979_v19 = vpop.f32.mrf.mxu2 }
 0x412   :  { %v1060_v18 = vmul.f32 0.001953125, %v1006_v11  ;;  %v980_v26 = vadd.f32 %v979_v19, %v951_v22 }
 0x414   :  { %1066 = vperm.xlu0 %1465, %v1060_v18   ;;  %v1062_v33 = vmul.f32 %v1060_v18, %v1060_v18 }
 0x416   :  { %v1475_v24 = vpop.eup %1474 }
 0x417   :  { %v1026_v27 = vmul.f32 %v1475_v24, %v1024_v51  ;;  %v1008_v29 = vpop.f32.mrf.mxu3  ;;  %vm1032_vm13 = vweird.f32 %v1475_v24 }
 0x418   :  { %v1009_v30 = vadd.f32 %v1008_v29, %v980_v26  ;;  %vm1033_vm15 = vmor %vm1031_vm14, %vm1032_vm13 }
 0x419   :  { %v1027_v32 = vmul.f32 %v1475_v24, %v1026_v27 }
 0x41a   :  { %v1061_v37 = vmul.f32 0.001953125, %v1009_v30 }
 0x41b   :  { %v1028_v40 = vmul.f32 0.5, %v1027_v32 }
 0x41c   :  { %v1063_v46 = vsub.f32 %v1061_v37, %v1062_v33  ;;  %1469 = vset.pattern.permute.xlu0 %v1516_v53 }
 0x41d   :  { %v1029_v57 = vsub.f32 1.5, %v1028_v40  ;;  %1053 = vperm.xlu0 %1469, %v2675_v63  }
 0x41e   :  { %v1073_v58 = vadd.f32 1e-05, %v1063_v46 }
 0x41f   :  { %v1030_v50 = vmul.f32 %v1475_v24, %v1029_v57 }
 0x420   :  { %1476 = vrsqrt.f32 %v1073_v58  ;;  %vm1080_vm1 = vweird.f32 %v1073_v58 }
 0x421   :  { %v1034_v59 = vsel %vm1033_vm15, %v1475_v24, %v1030_v50 }
 0x422   :  { %1037 = vperm.xlu1 %1466, %v1034_v59  }
 0x425   :  { %1471 = vset.pattern.permute.xlu0 %v1517_v60 }
 0x426   :  { %v1477_v8 = vpop.eup %1476 }
 0x427   :  { %v1075_v38 = vmul.f32 %v1477_v8, %v1073_v58  ;;  %vm1081_vm0 = vweird.f32 %v1477_v8 }
 0x428   :  { %vm1082_vm2 = vmor %vm1080_vm1, %vm1081_vm0 }
 0x429   :  { %v1076_v25 = vmul.f32 %v1477_v8, %v1075_v38 }
 0x42a   :  { %1470 = vset.pattern.permute.xlu1 %v1517_v60 }
 0x42b   :  { %1102 = vperm.xlu1 %1470, %v2675_v63   ;;  %v1077_v62 = vmul.f32 0.5, %v1076_v25 }
 0x42d   :  { %v1078_v43 = vsub.f32 1.5, %v1077_v62 }
 0x42f   :  { %v1079_v49 = vmul.f32 %v1477_v8, %v1078_v43 }
 0x431   :  { %v1083_v56 = vsel %vm1082_vm2, %v1477_v8, %v1079_v49 }
 0x432   :  { %1086 = vperm.xlu2 %1467, %v1083_v56  }
 0x43a   :  { %1468 = vset.pattern.permute.xlu2 %v1518_v3 }
 0x43b   :  { %1094 = vperm.xlu2 %1468, %v1478_v16  }
 0x45e   :  { %v1018_v2 = vpop.permute.xlu2 %1017 }
 0x45f   :  { %v1020_v63 = vsub.f32 %v2505_v41, %v1018_v2  ;;  %v1021_v9 = vsub.f32 %v2507_v44, %v1018_v2  ;;  %v1022_v10 = vsub.f32 %v2511_v45, %v1018_v2  ;;  %v1023_v54 = vsub.f32 %v2518_v52, %v1018_v2 }
 0x486   :  { %v1067_v48 = vpop.permute.xlu0 %1066 }
 0x487   :  { %v1069_v35 = vsub.f32 %v2671_v15, %v1067_v48  ;;  %v1070_v6 = vsub.f32 %v2672_v17, %v1067_v48  ;;  %v1071_v28 = vsub.f32 %v2673_v20, %v1067_v48  ;;  %v1072_v13 = vsub.f32 %v2674_v42, %v1067_v48 }
 0x48c   :  { %v1087_v12 = vpop.permute.xlu2 %1086 }
 0x48d   :  { %v1089_v21 = vmul.f32 %v1087_v12, %v1069_v35  ;;  %v1090_v52 = vmul.f32 %v1087_v12, %v1070_v6  ;;  %v1091_v34 = vmul.f32 %v1087_v12, %v1071_v28  ;;  %v1092_v1 = vmul.f32 %v1087_v12, %v1072_v13 }
 0x48f   :  { %v1054_v51 = vpop.permute.xlu0 %1053 }
 0x494   :  { %v1038_v31 = vpop.permute.xlu1 %1037 }
 0x495   :  { %v1040_v0 = vmul.f32 %v1038_v31, %v1020_v63  ;;  %v1041_v4 = vmul.f32 %v1038_v31, %v1021_v9  ;;  %v1042_v39 = vmul.f32 %v1038_v31, %v1022_v10  ;;  %v1043_v36 = vmul.f32 %v1038_v31, %v1023_v54  ;;  %v1095_v41 = vpop.permute.xlu2 %1094 }
 0x496   :  { %v1097_v7 = vmul.f32 %v1095_v41, %v1089_v21  ;;  %v1098_v47 = vmul.f32 %v1095_v41, %v1090_v52  ;;  %v1099_v11 = vmul.f32 %v1095_v41, %v1091_v34  ;;  %v1100_v15 = vmul.f32 %v1095_v41, %v1092_v1 }
 0x497   :  { %v1048_v61 = vmul.f32 %v1046_v55, %v1040_v0  ;;  %v1049_v44 = vmul.f32 %v1046_v55, %v1041_v4  ;;  %v1050_v14 = vmul.f32 %v1046_v55, %v1042_v39  ;;  %v1051_v45 = vmul.f32 %v1046_v55, %v1043_v36 }
 0x499   :  { %v1056_v5 = vadd.f32 %v1054_v51, %v1048_v61  ;;  %v1057_v17 = vadd.f32 %v1054_v51, %v1049_v44  ;;  %v1058_v23 = vadd.f32 %v1054_v51, %v1050_v14  ;;  %v1059_v20 = vadd.f32 %v1054_v51, %v1051_v45 }
 0x49d   :  { %v1103_v18 = vpop.permute.xlu1 %1102 }
 0x49e   :  { %v1105_v42 = vadd.f32 %v1103_v18, %v1097_v7  ;;  %v1106_v19 = vadd.f32 %v1103_v18, %v1098_v47  ;;  %v1107_v22 = vadd.f32 %v1103_v18, %v1099_v11  ;;  %v1108_v24 = vadd.f32 %v1103_v18, %v1100_v15 }
 0x4a0   :  { %v1109_v26 = vadd.f32 %v1105_v42, %v1056_v5  ;;  %v1110_v27 = vadd.f32 %v1106_v19, %v1057_v17  ;;  %v1111_v29 = vadd.f32 %v1107_v22, %v1058_v23  ;;  %v1112_v30 = vadd.f32 %v1108_v24, %v1059_v20 }
 0x4a2   :  { %v1113_v32 = vmax.f32 %v1109_v26, 0.0  ;;  %v1114_v33 = vmax.f32 %v1110_v27, 0.0  ;;  %v1115_v37 = vmax.f32 %v1111_v29, 0.0  ;;  %v1116_v40 = vmax.f32 %v1112_v30, 0.0 }
 0x4a4   :  { %1117 = vst [vmem:[#allocation2] sm:$0xff] %v1113_v32 }
 0x4a5   :  { %1118 = vst [vmem:[#allocation2 + $0x8] sm:$0xff] %v1114_v33 }
 0x4a6   :  { %1119 = vst [vmem:[#allocation2 + $0x10] sm:$0xff] %v1115_v37 }
 0x4a7   :  { %1120 = vst [vmem:[#allocation2 + $0x18] sm:$0xff] %v1116_v40 }
 0x4a8   :  { %1131 = dma.vmem_to_hbm [thread:$0]  %s1127_s0, 512, %s1129_s6, [#allocation3]  }
 0x4a9   :  { %1503 = dma.done.wait [#allocation3], 512  }
 0x4aa   :  { %1504 = vsyncadd [#allocation3], 4294966784 }
 0x4ab   :  { %1136 = vsyncpa [#allocation3], 1 }

</bundles_post_ra>
